<compile_context>
chip_gen: v7x
topology: tpu7x:2x2x1
jax: 0.10.0
libtpu: 0.0.40
codegen_flags: <defaults>
</compile_context>

<pallas_src>
import functools

import jax
import jax.numpy as jnp
from jax.experimental import pallas as pl
from jax.experimental.pallas import tpu as pltpu

UNITS = 128


def actor_kernel(sg_ref, memx_ref,
                 w_ff_ref, b_ff_ref,
                 w_ih_ref, w_hh_ref, b_lstm_ref,
                 w_m1f_ref, w_m1h_ref, b_m1_ref,
                 w_m2_ref, b_m2_ref,
                 w_m3_ref, b_m3_ref,
                 bound_ref, out_ref, *, T, B_pad):
    H = UNITS

    # ---- hoisted LSTM input projection: all T steps in one MXU matmul ----
    # memx_ref: (T*B_pad, dim_state+dim_action), w_ih_ref: (D, 4H) in [i,f,o,g]
    gates_x = jnp.dot(memx_ref[...], w_ih_ref[...],
                      preferred_element_type=jnp.float32) + b_lstm_ref[...]

    # ---- ff branch (independent of the recurrence, issued up front) ----
    ff = jnp.maximum(jnp.dot(sg_ref[...], w_ff_ref[...],
                             preferred_element_type=jnp.float32)
                     + b_ff_ref[...], 0.0)
    # ff-side contribution to merged layer 1 (replaces the lane-axis concat).
    ff_part = jnp.dot(ff, w_m1f_ref[...],
                      preferred_element_type=jnp.float32) + b_m1_ref[...]

    w_hh = w_hh_ref[...]        # (H, 4H), gate order [i, f, o, g]

    # ---- recurrence: fully unrolled, only h @ W_hh on the serial chain ----
    h = jnp.zeros((B_pad, H), jnp.float32)
    c = jnp.zeros((B_pad, H), jnp.float32)
    for t in range(T):                              # static unroll (T small)
        gates = gates_x[t * B_pad:(t + 1) * B_pad, :] + jnp.dot(
            h, w_hh, preferred_element_type=jnp.float32)
        sig = jax.nn.sigmoid(gates[:, 0:3 * H])     # one EUP launch for i,f,o
        i_g = sig[:, 0:H]
        f_g = sig[:, H:2 * H]
        o_g = sig[:, 2 * H:3 * H]
        g_g = jnp.tanh(gates[:, 3 * H:4 * H])       # one EUP launch for g
        c = f_g * c + i_g * g_g
        h = o_g * jnp.tanh(c)

    # ---- merged branch: Linear->ReLU, Linear->ReLU, Linear->Tanh, scale ----
    m1 = jnp.maximum(ff_part + jnp.dot(h, w_m1h_ref[...],
                                       preferred_element_type=jnp.float32), 0.0)
    m2 = jnp.maximum(jnp.dot(m1, w_m2_ref[...],
                             preferred_element_type=jnp.float32)
                     + b_m2_ref[...], 0.0)
    m3 = jnp.tanh(jnp.dot(m2, w_m3_ref[...],
                          preferred_element_type=jnp.float32) + b_m3_ref[...])
    out_ref[...] = m3 * bound_ref[...]              # (B_pad, A_pad) lane-dense


def actor_forward(state, goal, memory, params):
    """state: (B, dim_state), goal: (B, dim_goal), memory: (B, T, dim_state+dim_action)."""
    H = UNITS
    B = state.shape[0]
    T = memory.shape[1]
    dim_action = params["w_m3"].shape[1]

    B_pad = ((B + 7) // 8) * 8                       # sublane multiple
    A_pad = ((dim_action + 127) // 128) * 128        # lane-dense output row

    # --- glue: gate permutation [i, f, g, o] -> [i, f, o, g] ---
    def perm_gates(w):
        return jnp.concatenate(
            [w[..., 0:H], w[..., H:2 * H], w[..., 3 * H:4 * H], w[..., 2 * H:3 * H]],
            axis=-1)

    w_ih_p = perm_gates(params["w_ih"])
    w_hh_p = perm_gates(params["w_hh"])
    b_lstm_p = perm_gates(params["b_lstm"])

    # --- glue: pad batch, flatten memory time-major ---
    sg = jnp.concatenate([state, goal], axis=-1)                     # (B, ds+dg)
    sg_pad = jnp.zeros((B_pad, sg.shape[1]), jnp.float32).at[:B].set(sg)

    mem_t = jnp.transpose(memory, (1, 0, 2))                         # (T, B, D)
    d_l = mem_t.shape[2]
    mem_pad = jnp.zeros((T, B_pad, d_l), jnp.float32).at[:, :B].set(mem_t)
    mem_flat = mem_pad.reshape(T * B_pad, d_l)                       # (T*B_pad, D)

    # --- glue: split merged-layer-1 weight (kills the concat) ---
    w_m1_ff = params["w_m1"][:H]                                     # (H, H)
    w_m1_h = params["w_m1"][H:]                                      # (H, H)

    # --- glue: pad the output projection / bound to a full 128-lane row ---
    w_m3_pad = jnp.zeros((H, A_pad), jnp.float32).at[:, :dim_action].set(params["w_m3"])
    b_m3_pad = jnp.zeros((1, A_pad), jnp.float32).at[:, :dim_action].set(params["b_m3"])
    bound_pad = jnp.zeros((1, A_pad), jnp.float32).at[:, :dim_action].set(params["bound"])

    args = (sg_pad, mem_flat,
            params["w_ff"], params["b_ff"],
            w_ih_p, w_hh_p, b_lstm_p,
            w_m1_ff, w_m1_h, params["b_m1"],
            params["w_m2"], params["b_m2"],
            w_m3_pad, b_m3_pad, bound_pad)

    # advisory cost estimate so XLA can overlap surrounding work
    d_ff_in = sg.shape[1]
    flops = 2 * (T * B_pad * d_l * 4 * H       # hoisted input projection
                 + B_pad * d_ff_in * H         # ff branch
                 + B_pad * H * H               # ff_part
                 + T * B_pad * H * 4 * H       # recurrence (h @ W_hh)
                 + B_pad * H * H               # m1 (h side)
                 + B_pad * H * H               # m2
                 + B_pad * H * A_pad)          # m3
    transcendentals = T * B_pad * 5 * H + B_pad * A_pad
    bytes_accessed = int(sum(int(a.size) * a.dtype.itemsize for a in args)
                         + B_pad * A_pad * 4)

    kernel = functools.partial(actor_kernel, T=T, B_pad=B_pad)

    out_pad = pl.pallas_call(
        kernel,
        out_shape=jax.ShapeDtypeStruct((B_pad, A_pad), jnp.float32),
        in_specs=[pl.BlockSpec(memory_space=pltpu.MemorySpace.VMEM)] * len(args),
        out_specs=pl.BlockSpec(memory_space=pltpu.MemorySpace.VMEM),
        cost_estimate=pl.CostEstimate(flops=flops,
                                      transcendentals=transcendentals,
                                      bytes_accessed=bytes_accessed),
    )(*args)

    return out_pad[:B, :dim_action]


def make_params(key, dim_state, dim_goal, dim_action):
    """Deterministic synthetic init mirroring the PyTorch module's shapes."""
    ks = jax.random.split(key, 12)
    H = UNITS
    d_ff_in = dim_state + dim_goal
    d_lstm_in = dim_state + dim_action

    def lin(k, fan_in, fan_out):
        bound = 1.0 / jnp.sqrt(fan_in)
        kw, kb = jax.random.split(k)
        w = jax.random.uniform(kw, (fan_in, fan_out), jnp.float32, -bound, bound)
        b = jax.random.uniform(kb, (1, fan_out), jnp.float32, -bound, bound)
        return w, b

    w_ff, b_ff = lin(ks[0], d_ff_in, H)

    # LSTM params: weight_ih (4H, in) / weight_hh (4H, H) stored transposed,
    # PyTorch gate order [i, f, g, o]; b_ih + b_hh pre-summed.
    lb = 1.0 / jnp.sqrt(H)
    w_ih = jax.random.uniform(ks[1], (d_lstm_in, 4 * H), jnp.float32, -lb, lb)
    w_hh = jax.random.uniform(ks[2], (H, 4 * H), jnp.float32, -lb, lb)
    b_ih = jax.random.uniform(ks[3], (1, 4 * H), jnp.float32, -lb, lb)
    b_hh = jax.random.uniform(ks[4], (1, 4 * H), jnp.float32, -lb, lb)
    b_lstm = b_ih + b_hh

    w_m1, b_m1 = lin(ks[5], 2 * H, H)
    w_m2, b_m2 = lin(ks[6], H, H)
    # final layer: weight uniform(-0.003, 0.003) as in the module
    w_m3 = jax.random.uniform(ks[7], (H, dim_action), jnp.float32, -0.003, 0.003)
    b_m3 = jax.random.uniform(ks[8], (1, dim_action), jnp.float32,
                              -1.0 / jnp.sqrt(H), 1.0 / jnp.sqrt(H))

    # action bound (env.action_space.high) — synthetic deterministic value
    bound = jnp.full((1, dim_action), 2.0, jnp.float32)

    return dict(w_ff=w_ff, b_ff=b_ff, w_ih=w_ih, w_hh=w_hh, b_lstm=b_lstm,
                w_m1=w_m1, b_m1=b_m1, w_m2=w_m2, b_m2=b_m2,
                w_m3=w_m3, b_m3=b_m3, bound=bound)


def actor_forward_ref(state, goal, memory, params):
    """Pure-JAX reference (same math as torch forward) for verification."""
    H = UNITS
    sg = jnp.concatenate([state, goal], axis=-1)
    ff = jnp.maximum(sg @ params["w_ff"] + params["b_ff"], 0.0)

    B, T, _ = memory.shape
    h = jnp.zeros((B, H), jnp.float32)
    c = jnp.zeros((B, H), jnp.float32)
    for t in range(T):
        x = memory[:, t, :]
        gates = x @ params["w_ih"] + h @ params["w_hh"] + params["b_lstm"]
        i_g = jax.nn.sigmoid(gates[:, 0:H])
        f_g = jax.nn.sigmoid(gates[:, H:2 * H])
        g_g = jnp.tanh(gates[:, 2 * H:3 * H])
        o_g = jax.nn.sigmoid(gates[:, 3 * H:4 * H])
        c = f_g * c + i_g * g_g
        h = o_g * jnp.tanh(c)

    merged = jnp.concatenate([ff, h], axis=-1)
    m1 = jnp.maximum(merged @ params["w_m1"] + params["b_m1"], 0.0)
    m2 = jnp.maximum(m1 @ params["w_m2"] + params["b_m2"], 0.0)
    m3 = jnp.tanh(m2 @ params["w_m3"] + params["b_m3"])
    return m3 * params["bound"]


if __name__ == "__main__":
    B, T = 2, 8
    dim_state, dim_goal, dim_action = 10, 3, 4

    key = jax.random.PRNGKey(0)
    k_p, k_s, k_g, k_m = jax.random.split(key, 4)

    params = make_params(k_p, dim_state, dim_goal, dim_action)
    state = jax.random.normal(k_s, (B, dim_state), jnp.float32)
    goal = jax.random.normal(k_g, (B, dim_goal), jnp.float32)
    memory = jax.random.normal(k_m, (B, T, dim_state + dim_action), jnp.float32)

    out = actor_forward(state, goal, memory, params)
    out = jax.block_until_ready(out)

    ref = actor_forward_ref(state, goal, memory, params)
    assert out.shape == (B, dim_action)
    assert jnp.allclose(out, ref, atol=1e-5, rtol=1e-5), (out, ref)

    print("KERNEL_OK")
</pallas_src>

<mosaic_0001>
module attributes {stable_mosaic.version = 11 : i64} {
  func.func @actor_kernel(%arg0: memref<8x13xf32, #tpu.memory_space<vmem>>, %arg1: memref<64x14xf32, #tpu.memory_space<vmem>>, %arg2: memref<13x128xf32, #tpu.memory_space<vmem>>, %arg3: memref<1x128xf32, #tpu.memory_space<vmem>>, %arg4: memref<14x512xf32, #tpu.memory_space<vmem>>, %arg5: memref<128x512xf32, #tpu.memory_space<vmem>>, %arg6: memref<1x512xf32, #tpu.memory_space<vmem>>, %arg7: memref<128x128xf32, #tpu.memory_space<vmem>>, %arg8: memref<128x128xf32, #tpu.memory_space<vmem>>, %arg9: memref<1x128xf32, #tpu.memory_space<vmem>>, %arg10: memref<128x128xf32, #tpu.memory_space<vmem>>, %arg11: memref<1x128xf32, #tpu.memory_space<vmem>>, %arg12: memref<128x128xf32, #tpu.memory_space<vmem>>, %arg13: memref<1x128xf32, #tpu.memory_space<vmem>>, %arg14: memref<1x128xf32, #tpu.memory_space<vmem>>, %arg15: memref<8x128xf32, #tpu.memory_space<vmem>>) attributes {dimension_semantics = [], scalar_prefetch = 0 : i64, scratch_operands = 0 : i64, tpu.core_type = #tpu.core_type<tc>} {
    %c0 = arith.constant 0 : index
    %c0_0 = arith.constant 0 : index
    %0 = vector.load %arg1[%c0, %c0_0] : memref<64x14xf32, #tpu.memory_space<vmem>>, vector<64x14xf32>
    %c0_1 = arith.constant 0 : index
    %c0_2 = arith.constant 0 : index
    %1 = vector.load %arg4[%c0_1, %c0_2] : memref<14x512xf32, #tpu.memory_space<vmem>>, vector<14x512xf32>
    %cst = arith.constant dense<0.000000e+00> : vector<64x512xf32>
    %2 = tpu.matmul %0, %1, %cst {dimension_numbers = #tpu.dot_dimension_numbers<[1], [0], [0], [1], [0, 0, 1, 1], [], []>} : vector<64x14xf32>, vector<14x512xf32>, vector<64x512xf32> -> vector<64x512xf32>
    %c0_3 = arith.constant 0 : index
    %c0_4 = arith.constant 0 : index
    %3 = vector.load %arg6[%c0_3, %c0_4] : memref<1x512xf32, #tpu.memory_space<vmem>>, vector<1x512xf32>
    %4 = vector.broadcast %3 : vector<1x512xf32> to vector<64x512xf32>
    %5 = arith.addf %2, %4 : vector<64x512xf32>
    %c0_5 = arith.constant 0 : index
    %c0_6 = arith.constant 0 : index
    %6 = vector.load %arg0[%c0_5, %c0_6] : memref<8x13xf32, #tpu.memory_space<vmem>>, vector<8x13xf32>
    %c0_7 = arith.constant 0 : index
    %c0_8 = arith.constant 0 : index
    %7 = vector.load %arg2[%c0_7, %c0_8] : memref<13x128xf32, #tpu.memory_space<vmem>>, vector<13x128xf32>
    %cst_9 = arith.constant dense<0.000000e+00> : vector<8x128xf32>
    %8 = tpu.matmul %6, %7, %cst_9 {dimension_numbers = #tpu.dot_dimension_numbers<[1], [0], [0], [1], [0, 0, 1, 1], [], []>} : vector<8x13xf32>, vector<13x128xf32>, vector<8x128xf32> -> vector<8x128xf32>
    %c0_10 = arith.constant 0 : index
    %c0_11 = arith.constant 0 : index
    %9 = vector.load %arg3[%c0_10, %c0_11] : memref<1x128xf32, #tpu.memory_space<vmem>>, vector<1x128xf32>
    %10 = vector.broadcast %9 : vector<1x128xf32> to vector<8x128xf32>
    %11 = arith.addf %8, %10 : vector<8x128xf32>
    %cst_12 = arith.constant 0.000000e+00 : f32
    %12 = vector.broadcast %cst_12 : f32 to vector<8x128xf32>
    %13 = arith.maximumf %11, %12 : vector<8x128xf32>
    %c0_13 = arith.constant 0 : index
    %c0_14 = arith.constant 0 : index
    %14 = vector.load %arg7[%c0_13, %c0_14] : memref<128x128xf32, #tpu.memory_space<vmem>>, vector<128x128xf32>
    %cst_15 = arith.constant dense<0.000000e+00> : vector<8x128xf32>
    %15 = tpu.matmul %13, %14, %cst_15 {dimension_numbers = #tpu.dot_dimension_numbers<[1], [0], [0], [1], [0, 0, 1, 1], [], []>} : vector<8x128xf32>, vector<128x128xf32>, vector<8x128xf32> -> vector<8x128xf32>
    %c0_16 = arith.constant 0 : index
    %c0_17 = arith.constant 0 : index
    %16 = vector.load %arg9[%c0_16, %c0_17] : memref<1x128xf32, #tpu.memory_space<vmem>>, vector<1x128xf32>
    %17 = vector.broadcast %16 : vector<1x128xf32> to vector<8x128xf32>
    %18 = arith.addf %15, %17 : vector<8x128xf32>
    %c0_18 = arith.constant 0 : index
    %c0_19 = arith.constant 0 : index
    %19 = vector.load %arg5[%c0_18, %c0_19] : memref<128x512xf32, #tpu.memory_space<vmem>>, vector<128x512xf32>
    %cst_20 = arith.constant 0.000000e+00 : f32
    %20 = vector.broadcast %cst_20 : f32 to vector<8x128xf32>
    %cst_21 = arith.constant 0.000000e+00 : f32
    %21 = vector.broadcast %cst_21 : f32 to vector<8x128xf32>
    %22 = vector.extract_strided_slice %5 {offsets = [0, 0], sizes = [8, 512], strides = [1, 1]} : vector<64x512xf32> to vector<8x512xf32>
    %cst_22 = arith.constant dense<0.000000e+00> : vector<8x512xf32>
    %23 = tpu.matmul %20, %19, %cst_22 {dimension_numbers = #tpu.dot_dimension_numbers<[1], [0], [0], [1], [0, 0, 1, 1], [], []>} : vector<8x128xf32>, vector<128x512xf32>, vector<8x512xf32> -> vector<8x512xf32>
    %24 = arith.addf %22, %23 : vector<8x512xf32>
    %25 = vector.extract_strided_slice %24 {offsets = [0, 0], sizes = [8, 384], strides = [1, 1]} : vector<8x512xf32> to vector<8x384xf32>
    %26 = arith.negf %25 : vector<8x384xf32>
    %27 = math.exp %26 : vector<8x384xf32>
    %cst_23 = arith.constant 1.000000e+00 : f32
    %28 = vector.broadcast %cst_23 : f32 to vector<8x384xf32>
    %29 = arith.addf %28, %27 : vector<8x384xf32>
    %30 = arith.divf %28, %29 : vector<8x384xf32>
    %31 = vector.extract_strided_slice %30 {offsets = [0, 0], sizes = [8, 128], strides = [1, 1]} : vector<8x384xf32> to vector<8x128xf32>
    %32 = vector.extract_strided_slice %30 {offsets = [0, 128], sizes = [8, 128], strides = [1, 1]} : vector<8x384xf32> to vector<8x128xf32>
    %33 = vector.extract_strided_slice %30 {offsets = [0, 256], sizes = [8, 128], strides = [1, 1]} : vector<8x384xf32> to vector<8x128xf32>
    %34 = vector.extract_strided_slice %24 {offsets = [0, 384], sizes = [8, 128], strides = [1, 1]} : vector<8x512xf32> to vector<8x128xf32>
    %35 = math.tanh %34 : vector<8x128xf32>
    %36 = arith.mulf %32, %21 : vector<8x128xf32>
    %37 = arith.mulf %31, %35 : vector<8x128xf32>
    %38 = arith.addf %36, %37 : vector<8x128xf32>
    %39 = math.tanh %38 : vector<8x128xf32>
    %40 = arith.mulf %33, %39 : vector<8x128xf32>
    %41 = vector.extract_strided_slice %5 {offsets = [8, 0], sizes = [8, 512], strides = [1, 1]} : vector<64x512xf32> to vector<8x512xf32>
    %cst_24 = arith.constant dense<0.000000e+00> : vector<8x512xf32>
    %42 = tpu.matmul %40, %19, %cst_24 {dimension_numbers = #tpu.dot_dimension_numbers<[1], [0], [0], [1], [0, 0, 1, 1], [], []>} : vector<8x128xf32>, vector<128x512xf32>, vector<8x512xf32> -> vector<8x512xf32>
    %43 = arith.addf %41, %42 : vector<8x512xf32>
    %44 = vector.extract_strided_slice %43 {offsets = [0, 0], sizes = [8, 384], strides = [1, 1]} : vector<8x512xf32> to vector<8x384xf32>
    %45 = arith.negf %44 : vector<8x384xf32>
    %46 = math.exp %45 : vector<8x384xf32>
    %cst_25 = arith.constant 1.000000e+00 : f32
    %47 = vector.broadcast %cst_25 : f32 to vector<8x384xf32>
    %48 = arith.addf %47, %46 : vector<8x384xf32>
    %49 = arith.divf %47, %48 : vector<8x384xf32>
    %50 = vector.extract_strided_slice %49 {offsets = [0, 0], sizes = [8, 128], strides = [1, 1]} : vector<8x384xf32> to vector<8x128xf32>
    %51 = vector.extract_strided_slice %49 {offsets = [0, 128], sizes = [8, 128], strides = [1, 1]} : vector<8x384xf32> to vector<8x128xf32>
    %52 = vector.extract_strided_slice %49 {offsets = [0, 256], sizes = [8, 128], strides = [1, 1]} : vector<8x384xf32> to vector<8x128xf32>
    %53 = vector.extract_strided_slice %43 {offsets = [0, 384], sizes = [8, 128], strides = [1, 1]} : vector<8x512xf32> to vector<8x128xf32>
    %54 = math.tanh %53 : vector<8x128xf32>
    %55 = arith.mulf %51, %38 : vector<8x128xf32>
    %56 = arith.mulf %50, %54 : vector<8x128xf32>
    %57 = arith.addf %55, %56 : vector<8x128xf32>
    %58 = math.tanh %57 : vector<8x128xf32>
    %59 = arith.mulf %52, %58 : vector<8x128xf32>
    %60 = vector.extract_strided_slice %5 {offsets = [16, 0], sizes = [8, 512], strides = [1, 1]} : vector<64x512xf32> to vector<8x512xf32>
    %cst_26 = arith.constant dense<0.000000e+00> : vector<8x512xf32>
    %61 = tpu.matmul %59, %19, %cst_26 {dimension_numbers = #tpu.dot_dimension_numbers<[1], [0], [0], [1], [0, 0, 1, 1], [], []>} : vector<8x128xf32>, vector<128x512xf32>, vector<8x512xf32> -> vector<8x512xf32>
    %62 = arith.addf %60, %61 : vector<8x512xf32>
    %63 = vector.extract_strided_slice %62 {offsets = [0, 0], sizes = [8, 384], strides = [1, 1]} : vector<8x512xf32> to vector<8x384xf32>
    %64 = arith.negf %63 : vector<8x384xf32>
    %65 = math.exp %64 : vector<8x384xf32>
    %cst_27 = arith.constant 1.000000e+00 : f32
    %66 = vector.broadcast %cst_27 : f32 to vector<8x384xf32>
    %67 = arith.addf %66, %65 : vector<8x384xf32>
    %68 = arith.divf %66, %67 : vector<8x384xf32>
    %69 = vector.extract_strided_slice %68 {offsets = [0, 0], sizes = [8, 128], strides = [1, 1]} : vector<8x384xf32> to vector<8x128xf32>
    %70 = vector.extract_strided_slice %68 {offsets = [0, 128], sizes = [8, 128], strides = [1, 1]} : vector<8x384xf32> to vector<8x128xf32>
    %71 = vector.extract_strided_slice %68 {offsets = [0, 256], sizes = [8, 128], strides = [1, 1]} : vector<8x384xf32> to vector<8x128xf32>
    %72 = vector.extract_strided_slice %62 {offsets = [0, 384], sizes = [8, 128], strides = [1, 1]} : vector<8x512xf32> to vector<8x128xf32>
    %73 = math.tanh %72 : vector<8x128xf32>
    %74 = arith.mulf %70, %57 : vector<8x128xf32>
    %75 = arith.mulf %69, %73 : vector<8x128xf32>
    %76 = arith.addf %74, %75 : vector<8x128xf32>
    %77 = math.tanh %76 : vector<8x128xf32>
    %78 = arith.mulf %71, %77 : vector<8x128xf32>
    %79 = vector.extract_strided_slice %5 {offsets = [24, 0], sizes = [8, 512], strides = [1, 1]} : vector<64x512xf32> to vector<8x512xf32>
    %cst_28 = arith.constant dense<0.000000e+00> : vector<8x512xf32>
    %80 = tpu.matmul %78, %19, %cst_28 {dimension_numbers = #tpu.dot_dimension_numbers<[1], [0], [0], [1], [0, 0, 1, 1], [], []>} : vector<8x128xf32>, vector<128x512xf32>, vector<8x512xf32> -> vector<8x512xf32>
    %81 = arith.addf %79, %80 : vector<8x512xf32>
    %82 = vector.extract_strided_slice %81 {offsets = [0, 0], sizes = [8, 384], strides = [1, 1]} : vector<8x512xf32> to vector<8x384xf32>
    %83 = arith.negf %82 : vector<8x384xf32>
    %84 = math.exp %83 : vector<8x384xf32>
    %cst_29 = arith.constant 1.000000e+00 : f32
    %85 = vector.broadcast %cst_29 : f32 to vector<8x384xf32>
    %86 = arith.addf %85, %84 : vector<8x384xf32>
    %87 = arith.divf %85, %86 : vector<8x384xf32>
    %88 = vector.extract_strided_slice %87 {offsets = [0, 0], sizes = [8, 128], strides = [1, 1]} : vector<8x384xf32> to vector<8x128xf32>
    %89 = vector.extract_strided_slice %87 {offsets = [0, 128], sizes = [8, 128], strides = [1, 1]} : vector<8x384xf32> to vector<8x128xf32>
    %90 = vector.extract_strided_slice %87 {offsets = [0, 256], sizes = [8, 128], strides = [1, 1]} : vector<8x384xf32> to vector<8x128xf32>
    %91 = vector.extract_strided_slice %81 {offsets = [0, 384], sizes = [8, 128], strides = [1, 1]} : vector<8x512xf32> to vector<8x128xf32>
    %92 = math.tanh %91 : vector<8x128xf32>
    %93 = arith.mulf %89, %76 : vector<8x128xf32>
    %94 = arith.mulf %88, %92 : vector<8x128xf32>
    %95 = arith.addf %93, %94 : vector<8x128xf32>
    %96 = math.tanh %95 : vector<8x128xf32>
    %97 = arith.mulf %90, %96 : vector<8x128xf32>
    %98 = vector.extract_strided_slice %5 {offsets = [32, 0], sizes = [8, 512], strides = [1, 1]} : vector<64x512xf32> to vector<8x512xf32>
    %cst_30 = arith.constant dense<0.000000e+00> : vector<8x512xf32>
    %99 = tpu.matmul %97, %19, %cst_30 {dimension_numbers = #tpu.dot_dimension_numbers<[1], [0], [0], [1], [0, 0, 1, 1], [], []>} : vector<8x128xf32>, vector<128x512xf32>, vector<8x512xf32> -> vector<8x512xf32>
    %100 = arith.addf %98, %99 : vector<8x512xf32>
    %101 = vector.extract_strided_slice %100 {offsets = [0, 0], sizes = [8, 384], strides = [1, 1]} : vector<8x512xf32> to vector<8x384xf32>
    %102 = arith.negf %101 : vector<8x384xf32>
    %103 = math.exp %102 : vector<8x384xf32>
    %cst_31 = arith.constant 1.000000e+00 : f32
    %104 = vector.broadcast %cst_31 : f32 to vector<8x384xf32>
    %105 = arith.addf %104, %103 : vector<8x384xf32>
    %106 = arith.divf %104, %105 : vector<8x384xf32>
    %107 = vector.extract_strided_slice %106 {offsets = [0, 0], sizes = [8, 128], strides = [1, 1]} : vector<8x384xf32> to vector<8x128xf32>
    %108 = vector.extract_strided_slice %106 {offsets = [0, 128], sizes = [8, 128], strides = [1, 1]} : vector<8x384xf32> to vector<8x128xf32>
    %109 = vector.extract_strided_slice %106 {offsets = [0, 256], sizes = [8, 128], strides = [1, 1]} : vector<8x384xf32> to vector<8x128xf32>
    %110 = vector.extract_strided_slice %100 {offsets = [0, 384], sizes = [8, 128], strides = [1, 1]} : vector<8x512xf32> to vector<8x128xf32>
    %111 = math.tanh %110 : vector<8x128xf32>
    %112 = arith.mulf %108, %95 : vector<8x128xf32>
    %113 = arith.mulf %107, %111 : vector<8x128xf32>
    %114 = arith.addf %112, %113 : vector<8x128xf32>
    %115 = math.tanh %114 : vector<8x128xf32>
    %116 = arith.mulf %109, %115 : vector<8x128xf32>
    %117 = vector.extract_strided_slice %5 {offsets = [40, 0], sizes = [8, 512], strides = [1, 1]} : vector<64x512xf32> to vector<8x512xf32>
    %cst_32 = arith.constant dense<0.000000e+00> : vector<8x512xf32>
    %118 = tpu.matmul %116, %19, %cst_32 {dimension_numbers = #tpu.dot_dimension_numbers<[1], [0], [0], [1], [0, 0, 1, 1], [], []>} : vector<8x128xf32>, vector<128x512xf32>, vector<8x512xf32> -> vector<8x512xf32>
    %119 = arith.addf %117, %118 : vector<8x512xf32>
    %120 = vector.extract_strided_slice %119 {offsets = [0, 0], sizes = [8, 384], strides = [1, 1]} : vector<8x512xf32> to vector<8x384xf32>
    %121 = arith.negf %120 : vector<8x384xf32>
    %122 = math.exp %121 : vector<8x384xf32>
    %cst_33 = arith.constant 1.000000e+00 : f32
    %123 = vector.broadcast %cst_33 : f32 to vector<8x384xf32>
    %124 = arith.addf %123, %122 : vector<8x384xf32>
    %125 = arith.divf %123, %124 : vector<8x384xf32>
    %126 = vector.extract_strided_slice %125 {offsets = [0, 0], sizes = [8, 128], strides = [1, 1]} : vector<8x384xf32> to vector<8x128xf32>
    %127 = vector.extract_strided_slice %125 {offsets = [0, 128], sizes = [8, 128], strides = [1, 1]} : vector<8x384xf32> to vector<8x128xf32>
    %128 = vector.extract_strided_slice %125 {offsets = [0, 256], sizes = [8, 128], strides = [1, 1]} : vector<8x384xf32> to vector<8x128xf32>
    %129 = vector.extract_strided_slice %119 {offsets = [0, 384], sizes = [8, 128], strides = [1, 1]} : vector<8x512xf32> to vector<8x128xf32>
    %130 = math.tanh %129 : vector<8x128xf32>
    %131 = arith.mulf %127, %114 : vector<8x128xf32>
    %132 = arith.mulf %126, %130 : vector<8x128xf32>
    %133 = arith.addf %131, %132 : vector<8x128xf32>
    %134 = math.tanh %133 : vector<8x128xf32>
    %135 = arith.mulf %128, %134 : vector<8x128xf32>
    %136 = vector.extract_strided_slice %5 {offsets = [48, 0], sizes = [8, 512], strides = [1, 1]} : vector<64x512xf32> to vector<8x512xf32>
    %cst_34 = arith.constant dense<0.000000e+00> : vector<8x512xf32>
    %137 = tpu.matmul %135, %19, %cst_34 {dimension_numbers = #tpu.dot_dimension_numbers<[1], [0], [0], [1], [0, 0, 1, 1], [], []>} : vector<8x128xf32>, vector<128x512xf32>, vector<8x512xf32> -> vector<8x512xf32>
    %138 = arith.addf %136, %137 : vector<8x512xf32>
    %139 = vector.extract_strided_slice %138 {offsets = [0, 0], sizes = [8, 384], strides = [1, 1]} : vector<8x512xf32> to vector<8x384xf32>
    %140 = arith.negf %139 : vector<8x384xf32>
    %141 = math.exp %140 : vector<8x384xf32>
    %cst_35 = arith.constant 1.000000e+00 : f32
    %142 = vector.broadcast %cst_35 : f32 to vector<8x384xf32>
    %143 = arith.addf %142, %141 : vector<8x384xf32>
    %144 = arith.divf %142, %143 : vector<8x384xf32>
    %145 = vector.extract_strided_slice %144 {offsets = [0, 0], sizes = [8, 128], strides = [1, 1]} : vector<8x384xf32> to vector<8x128xf32>
    %146 = vector.extract_strided_slice %144 {offsets = [0, 128], sizes = [8, 128], strides = [1, 1]} : vector<8x384xf32> to vector<8x128xf32>
    %147 = vector.extract_strided_slice %144 {offsets = [0, 256], sizes = [8, 128], strides = [1, 1]} : vector<8x384xf32> to vector<8x128xf32>
    %148 = vector.extract_strided_slice %138 {offsets = [0, 384], sizes = [8, 128], strides = [1, 1]} : vector<8x512xf32> to vector<8x128xf32>
    %149 = math.tanh %148 : vector<8x128xf32>
    %150 = arith.mulf %146, %133 : vector<8x128xf32>
    %151 = arith.mulf %145, %149 : vector<8x128xf32>
    %152 = arith.addf %150, %151 : vector<8x128xf32>
    %153 = math.tanh %152 : vector<8x128xf32>
    %154 = arith.mulf %147, %153 : vector<8x128xf32>
    %155 = vector.extract_strided_slice %5 {offsets = [56, 0], sizes = [8, 512], strides = [1, 1]} : vector<64x512xf32> to vector<8x512xf32>
    %cst_36 = arith.constant dense<0.000000e+00> : vector<8x512xf32>
    %156 = tpu.matmul %154, %19, %cst_36 {dimension_numbers = #tpu.dot_dimension_numbers<[1], [0], [0], [1], [0, 0, 1, 1], [], []>} : vector<8x128xf32>, vector<128x512xf32>, vector<8x512xf32> -> vector<8x512xf32>
    %157 = arith.addf %155, %156 : vector<8x512xf32>
    %158 = vector.extract_strided_slice %157 {offsets = [0, 0], sizes = [8, 384], strides = [1, 1]} : vector<8x512xf32> to vector<8x384xf32>
    %159 = arith.negf %158 : vector<8x384xf32>
    %160 = math.exp %159 : vector<8x384xf32>
    %cst_37 = arith.constant 1.000000e+00 : f32
    %161 = vector.broadcast %cst_37 : f32 to vector<8x384xf32>
    %162 = arith.addf %161, %160 : vector<8x384xf32>
    %163 = arith.divf %161, %162 : vector<8x384xf32>
    %164 = vector.extract_strided_slice %163 {offsets = [0, 0], sizes = [8, 128], strides = [1, 1]} : vector<8x384xf32> to vector<8x128xf32>
    %165 = vector.extract_strided_slice %163 {offsets = [0, 128], sizes = [8, 128], strides = [1, 1]} : vector<8x384xf32> to vector<8x128xf32>
    %166 = vector.extract_strided_slice %163 {offsets = [0, 256], sizes = [8, 128], strides = [1, 1]} : vector<8x384xf32> to vector<8x128xf32>
    %167 = vector.extract_strided_slice %157 {offsets = [0, 384], sizes = [8, 128], strides = [1, 1]} : vector<8x512xf32> to vector<8x128xf32>
    %168 = math.tanh %167 : vector<8x128xf32>
    %169 = arith.mulf %165, %152 : vector<8x128xf32>
    %170 = arith.mulf %164, %168 : vector<8x128xf32>
    %171 = arith.addf %169, %170 : vector<8x128xf32>
    %172 = math.tanh %171 : vector<8x128xf32>
    %173 = arith.mulf %166, %172 : vector<8x128xf32>
    %c0_38 = arith.constant 0 : index
    %c0_39 = arith.constant 0 : index
    %174 = vector.load %arg8[%c0_38, %c0_39] : memref<128x128xf32, #tpu.memory_space<vmem>>, vector<128x128xf32>
    %cst_40 = arith.constant dense<0.000000e+00> : vector<8x128xf32>
    %175 = tpu.matmul %173, %174, %cst_40 {dimension_numbers = #tpu.dot_dimension_numbers<[1], [0], [0], [1], [0, 0, 1, 1], [], []>} : vector<8x128xf32>, vector<128x128xf32>, vector<8x128xf32> -> vector<8x128xf32>
    %176 = arith.addf %18, %175 : vector<8x128xf32>
    %cst_41 = arith.constant 0.000000e+00 : f32
    %177 = vector.broadcast %cst_41 : f32 to vector<8x128xf32>
    %178 = arith.maximumf %176, %177 : vector<8x128xf32>
    %c0_42 = arith.constant 0 : index
    %c0_43 = arith.constant 0 : index
    %179 = vector.load %arg10[%c0_42, %c0_43] : memref<128x128xf32, #tpu.memory_space<vmem>>, vector<128x128xf32>
    %cst_44 = arith.constant dense<0.000000e+00> : vector<8x128xf32>
    %180 = tpu.matmul %178, %179, %cst_44 {dimension_numbers = #tpu.dot_dimension_numbers<[1], [0], [0], [1], [0, 0, 1, 1], [], []>} : vector<8x128xf32>, vector<128x128xf32>, vector<8x128xf32> -> vector<8x128xf32>
    %c0_45 = arith.constant 0 : index
    %c0_46 = arith.constant 0 : index
    %181 = vector.load %arg11[%c0_45, %c0_46] : memref<1x128xf32, #tpu.memory_space<vmem>>, vector<1x128xf32>
    %182 = vector.broadcast %181 : vector<1x128xf32> to vector<8x128xf32>
    %183 = arith.addf %180, %182 : vector<8x128xf32>
    %cst_47 = arith.constant 0.000000e+00 : f32
    %184 = vector.broadcast %cst_47 : f32 to vector<8x128xf32>
    %185 = arith.maximumf %183, %184 : vector<8x128xf32>
    %c0_48 = arith.constant 0 : index
    %c0_49 = arith.constant 0 : index
    %186 = vector.load %arg12[%c0_48, %c0_49] : memref<128x128xf32, #tpu.memory_space<vmem>>, vector<128x128xf32>
    %cst_50 = arith.constant dense<0.000000e+00> : vector<8x128xf32>
    %187 = tpu.matmul %185, %186, %cst_50 {dimension_numbers = #tpu.dot_dimension_numbers<[1], [0], [0], [1], [0, 0, 1, 1], [], []>} : vector<8x128xf32>, vector<128x128xf32>, vector<8x128xf32> -> vector<8x128xf32>
    %c0_51 = arith.constant 0 : index
    %c0_52 = arith.constant 0 : index
    %188 = vector.load %arg13[%c0_51, %c0_52] : memref<1x128xf32, #tpu.memory_space<vmem>>, vector<1x128xf32>
    %189 = vector.broadcast %188 : vector<1x128xf32> to vector<8x128xf32>
    %190 = arith.addf %187, %189 : vector<8x128xf32>
    %191 = math.tanh %190 : vector<8x128xf32>
    %c0_53 = arith.constant 0 : index
    %c0_54 = arith.constant 0 : index
    %192 = vector.load %arg14[%c0_53, %c0_54] : memref<1x128xf32, #tpu.memory_space<vmem>>, vector<1x128xf32>
    %193 = vector.broadcast %192 : vector<1x128xf32> to vector<8x128xf32>
    %194 = arith.mulf %191, %193 : vector<8x128xf32>
    %c0_55 = arith.constant 0 : index
    %c0_56 = arith.constant 0 : index
    %195 = vector.load %arg15[%c0_55, %c0_56] : memref<8x128xf32, #tpu.memory_space<vmem>>, vector<8x128xf32>
    tpu.vector_store %arg15[%c0_55, %c0_56], %194 {strides = array<i32>} : memref<8x128xf32, #tpu.memory_space<vmem>>, vector<8x128xf32>,
    return
  }
}

</mosaic_0001>

<bundles_post_ra>
// kernel: tpu_custom_call.1
= control target key start
LH: loop header
LB: loop body
LE: loop exit
PB: predicated region body
PF: predicated region fallthrough
CT: control target
= control target key end

     0   :  { %s4383_s0 = inlined_call_operand.vmem [shape: f32[8,13], index: 0, kind: input, shape index: {}]   ;;  %s4384_s1 = inlined_call_operand.vmem [shape: f32[64,14], index: 1, kind: input, shape index: {}]   ;;  %s4385_s2 = inlined_call_operand.vmem [shape: f32[13,128], index: 2, kind: input, shape index: {}]   ;;  %s4386_s3 = inlined_call_operand.vmem [shape: f32[1,128], index: 3, kind: input, shape index: {}]   ;;  %s4387_s4 = inlined_call_operand.vmem [shape: f32[14,512], index: 4, kind: input, shape index: {}]   ;;  %s4388_s5 = inlined_call_operand.hbm [shape: f32[128,512], index: 5, kind: input, shape index: {}]   ;;  %s4389_s6 = inlined_call_operand.vmem [shape: f32[1,512], index: 6, kind: input, shape index: {}]   ;;  %s4390_s7 = inlined_call_operand.hbm [shape: f32[128,128], index: 7, kind: input, shape index: {}]   ;;  %s4391_s8 = inlined_call_operand.hbm [shape: f32[128,128], index: 8, kind: input, shape index: {}]   ;;  %s4392_s9 = inlined_call_operand.vmem [shape: f32[1,128], index: 9, kind: input, shape index: {}]   ;;  %s4393_s10 = inlined_call_operand.hbm [shape: f32[128,128], index: 10, kind: input, shape index: {}]   ;;  %s4394_s11 = inlined_call_operand.vmem [shape: f32[1,128], index: 11, kind: input, shape index: {}]   ;;  %s4395_s12 = inlined_call_operand.hbm [shape: f32[128,128], index: 12, kind: input, shape index: {}]   ;;  %s4396_s13 = inlined_call_operand.vmem [shape: f32[1,128], index: 13, kind: input, shape index: {}]   ;;  %s4397_s14 = inlined_call_operand.vmem [shape: f32[1,128], index: 14, kind: input, shape index: {}]   ;;  %s4398_s15 = inlined_call_operand.hbm [shape: f32[8,128], index: 15, kind: output, shape index: {}]  }
   0x1   :  { %4400 = sst [smem:[#allocation16_spill]] %s4398_s15 }
   0x2   :  { %20 = vsyncpa [#allocation3], 0 }
   0x3   :  { %21 = vsyncpa [#allocation6], 0 }
   0x4   :  { %22 = vsyncpa [#allocation9], 0 }
   0x5   :  { %23 = vsyncpa [#allocation4], 0  ;;  %s3575_s18 = smov [#allocation5]   ;;  %s3435_s22 = scalar_lea.hbm %s4390_s7, 2048 }
   0x6   :  { %s53_s19 = sshll.u32 %s3575_s18, 4  ;;  %p3436_p0 = scmp.ne.s32.totalorder %s4390_s7, %s3435_s22  ;;  %s54_s19 = int_to_ptr.vmem [resolvable:$true] %s53_s19 }
   0x7   :  { %p3439_p1 = scmp.lt.u32.totalorder %s3435_s22, %s4390_s7 }
   0x9   :  { %p3441_p2 = pnand %p3439_p1, %p3436_p0 }
   0xb   :  { %3444 = shalt.err (!%p3441_p2)
}
   0xc   :  { %s3445_s27 = scalar_lea.vmem %s54_s19, 2048  ;;  %p3450_p4 = scmp.lt.s32.totalorder %s54_s19, %s54_s19 }
   0xd   :  { %p3446_p3 = scmp.ne.s32.totalorder %s54_s19, %s3445_s27  ;;  %p3451_p5 = scmp.lt.s32.totalorder %s3445_s27, %s3445_s27 }
   0xf   :  { %p3452_p6 = por %p3451_p5, %p3450_p4 }
  0x11   :  { %p3453_p7 = pnand %p3452_p6, %p3446_p3 }
  0x13   :  { %3456 = shalt.err (!%p3453_p7)
}
  0x14   :  { %s3576_s28 = smov 128   ;;  %s3577_s29 = smov 8  }
  0x15   :  { %59 = dma.hbm_to_vmem [thread:$0]  %s4390_s7, 2048, %s54_s19, [#allocation6], %s3576_s28, %s3576_s28, %s3577_s29  }
  0x16   :  { %s3578_s17 = smov [#allocation8]   ;;  %s3579_s20 = smov [#allocation2]  }
  0x17   :  { %s79_s18 = sshll.u32 %s3578_s17, 4  ;;  %s39_s21 = sshll.u32 %s3579_s20, 4  ;;  %s80_s18 = int_to_ptr.vmem [resolvable:$true] %s79_s18  ;;  %s40_s21 = int_to_ptr.vmem [resolvable:$true] %s39_s21 }
  0x18   :  { %s3457_s24 = scalar_lea.hbm %s4393_s10, 2048 }
  0x19   :  { %p3458_p8 = scmp.ne.s32.totalorder %s4393_s10, %s3457_s24  ;;  %p3461_p9 = scmp.lt.u32.totalorder %s3457_s24, %s4393_s10 }
  0x1b   :  { %p3463_p10 = pnand %p3461_p9, %p3458_p8 }
  0x1d   :  { %3466 = shalt.err (!%p3463_p10)
}
  0x1e   :  { %s3467_s7 = scalar_lea.vmem %s80_s18, 2048  ;;  %p3472_p12 = scmp.lt.s32.totalorder %s80_s18, %s80_s18 }
  0x1f   :  { %p3468_p11 = scmp.ne.s32.totalorder %s80_s18, %s3467_s7  ;;  %p3473_p13 = scmp.lt.s32.totalorder %s3467_s7, %s3467_s7 }
  0x21   :  { %p3474_p0 = por %p3473_p13, %p3472_p12 }
  0x23   :  { %p3475_p1 = pnand %p3474_p0, %p3468_p11 }
  0x25   :  { %3478 = shalt.err (!%p3475_p1)
}
  0x26   :  { %85 = dma.hbm_to_vmem [thread:$0]  %s4393_s10, 2048, %s80_s18, [#allocation9], %s3576_s28, %s3576_s28, %s3577_s29  }
  0x27   :  { %s3479_s17 = scalar_lea.hbm %s4388_s5, 8192 }
  0x28   :  { %p3480_p2 = scmp.ne.s32.totalorder %s4388_s5, %s3479_s17  ;;  %p3483_p3 = scmp.lt.u32.totalorder %s3479_s17, %s4388_s5 }
  0x2a   :  { %p3485_p4 = pnand %p3483_p3, %p3480_p2 }
  0x2c   :  { %3488 = shalt.err (!%p3485_p4)
}
  0x2d   :  { %s3489_s25 = scalar_lea.vmem %s40_s21, 8192  ;;  %p3494_p6 = scmp.lt.s32.totalorder %s40_s21, %s40_s21 }
  0x2e   :  { %p3490_p5 = scmp.ne.s32.totalorder %s40_s21, %s3489_s25  ;;  %p3495_p7 = scmp.lt.s32.totalorder %s3489_s25, %s3489_s25 }
  0x30   :  { %p3496_p8 = por %p3495_p7, %p3494_p6 }
  0x32   :  { %p3497_p9 = pnand %p3496_p8, %p3490_p5 }
  0x34   :  { %3500 = shalt.err (!%p3497_p9)
}
  0x35   :  { %s3580_s10 = smov 512   ;;  %s3581_s18 = smov 32  }
  0x36   :  { %45 = dma.hbm_to_vmem [thread:$0]  %s4388_s5, 8192, %s40_s21, [#allocation3], %s3580_s10, %s3580_s10, %s3581_s18  }
  0x37   :  { %s3582_s7 = smov [#allocation7]   ;;  %s3583_s30 = smov [#allocation10]  }
  0x38   :  { %s65_s19 = sshll.u32 %s3582_s7, 4  ;;  %s93_s16 = sshll.u32 %s3583_s30, 4  ;;  %s66_s19 = int_to_ptr.vmem [resolvable:$true] %s65_s19  ;;  %s94_s16 = int_to_ptr.vmem [resolvable:$true] %s93_s16 }
  0x39   :  { %s3501_s20 = scalar_lea.hbm %s4391_s8, 2048 }
  0x3a   :  { %p3502_p10 = scmp.ne.s32.totalorder %s4391_s8, %s3501_s20  ;;  %p3505_p11 = scmp.lt.u32.totalorder %s3501_s20, %s4391_s8 }
  0x3c   :  { %p3507_p12 = pnand %p3505_p11, %p3502_p10 }
  0x3e   :  { %3510 = shalt.err (!%p3507_p12)
}
  0x3f   :  { %s3511_s5 = scalar_lea.vmem %s66_s19, 2048  ;;  %p3516_p0 = scmp.lt.s32.totalorder %s66_s19, %s66_s19 }
  0x40   :  { %p3512_p13 = scmp.ne.s32.totalorder %s66_s19, %s3511_s5  ;;  %p3517_p1 = scmp.lt.s32.totalorder %s3511_s5, %s3511_s5 }
  0x42   :  { %p3518_p2 = por %p3517_p1, %p3516_p0 }
  0x44   :  { %p3519_p3 = pnand %p3518_p2, %p3512_p13 }
  0x46   :  { %3522 = shalt.err (!%p3519_p3)
}
  0x47   :  { %71 = dma.hbm_to_vmem [thread:$0]  %s4391_s8, 2048, %s66_s19, [#allocation6], %s3576_s28, %s3576_s28, %s3577_s29  }
  0x48   :  { %s3523_s27 = scalar_lea.hbm %s4395_s12, 2048 }
  0x49   :  { %p3524_p4 = scmp.ne.s32.totalorder %s4395_s12, %s3523_s27  ;;  %p3527_p5 = scmp.lt.u32.totalorder %s3523_s27, %s4395_s12 }
  0x4b   :  { %p3529_p6 = pnand %p3527_p5, %p3524_p4 }
  0x4d   :  { %3532 = shalt.err (!%p3529_p6)
}
  0x4e   :  { %s3533_s20 = scalar_lea.vmem %s94_s16, 2048  ;;  %p3538_p8 = scmp.lt.s32.totalorder %s94_s16, %s94_s16 }
  0x4f   :  { %p3534_p7 = scmp.ne.s32.totalorder %s94_s16, %s3533_s20  ;;  %p3539_p9 = scmp.lt.s32.totalorder %s3533_s20, %s3533_s20 }
  0x51   :  { %p3540_p10 = por %p3539_p9, %p3538_p8 }
  0x53   :  { %p3541_p11 = pnand %p3540_p10, %p3534_p7 }
  0x55   :  { %3544 = shalt.err (!%p3541_p11)
}
  0x56   :  { %99 = dma.hbm_to_vmem [thread:$0]  %s4395_s12, 2048, %s94_s16, [#allocation9], %s3576_s28, %s3576_s28, %s3577_s29  }
  0x57   :  { %3567 = dma.done.wait [#allocation3], 8192  }
  0x58   :  { %3568 = vsyncadd [#allocation3], 4294959104 }
  0x59   :  { %3569 = dma.done.wait [#allocation6], 4096  }
  0x5a   :  { %3570 = vsyncadd [#allocation6], 4294963200 }
  0x5b   :  { %3571 = dma.done.wait [#allocation9], 4096  }
  0x5c   :  { %3572 = vsyncadd [#allocation9], 4294963200  ;;  %v3584_v0 = vmov 0.0   ;;  %vm182_vm0 = vcmask 1045504   ;;  %vm3585_vm1 = vmmov 1   ;;  %v128_v2 = vld [vmem:[%s4387_s4 + $0x8] sm:$0xff] }
  0x5d   :  { %259 = vmatprep.mubr.f32.mxu0 %v3584_v0  ;;  %283 = vmatprep.mubr.f32.mxu1 %v3584_v0  ;;  %vm3744_vm2 = vmpackc.low %vm182_vm0, %vm3585_vm1  ;;  %v132_v3 = vld [vmem:[%s4387_s4 + $0x28] sm:$0x3f]  ;;  %v127_v4 = vld [vmem:[%s4387_s4] sm:$0xff]  ;;  %vm435_vm3 = vcmask 1044480   ;;  %vm157_vm4 = vcmask 113664   ;;  %v3586_v14 = vmov 0.0|0.0  }
  0x5e   :  { %v2598_v5 = vpack.c.bf16 %v132_v3, %v128_v2  ;;  %v131_v6 = vld [vmem:[%s4387_s4 + $0x20] sm:$0x3f]  ;;  %v423_v9 = vld [vmem:[%s4385_s2 + $0x8] sm:$0x1f]  ;;  %vm2612_vm5 = vmpackc.low %vm435_vm3, %vm3585_vm1  ;;  %vm3587_vm6 = vmmov 0   ;;  %vm431_vm7 = vcmask 105472  }
  0x5f   :  { %v422_v7 = vld [vmem:[%s4385_s2] sm:$0xff]  ;;  %v2601_v8 = vpack.c.bf16 %v131_v6, %v127_v4  ;;  %v604_v10 = vld [vmem:[#allocation2 + $0x8] sm:$0xff]  ;;  %v3798_v17 = vld [vmem:[%s4384_s1 + $0x10] sm:$0xff]  ;;  %s3588_s22 = smov [#allocation11]  }
  0x60   :  { %2600 = vmatprep.subr.msk.bf16.mxu0 %vm3744_vm2, %v2598_v5  ;;  %v608_v11 = vld [vmem:[#allocation2 + $0x28] sm:$0xff]  ;;  %3222 = vmatprep.subr.msk.bf16.mxu1 %vm3744_vm2, %v2598_v5  ;;  %v3775_v12 = vld [vmem:[%s4384_s1] sm:$0xff]  ;;  %v2611_v13 = vpack.c.bf16 %v423_v9, %v422_v7  ;;  %v130_v19 = vld [vmem:[%s4387_s4 + $0x18] sm:$0xff]  ;;  %s2318_s12 = sshll.u32 %s3588_s22, 4  ;;  %s2319_s12 = int_to_ptr.vmem [resolvable:$true] %s2318_s12 }
  0x61   :  { %2603 = vmatpush1.bf16.msk.msra.mxu0 %vm3744_vm2, %v2601_v8  ;;  %3223 = vmatpush1.bf16.msk.msra.mxu1 %vm3744_vm2, %v2601_v8  ;;  %v3781_v15 = vpack.c.bf16 %v608_v11, %v604_v10  ;;  %v3789_v16 = vld [vmem:[%s4384_s1 + $0x8] sm:$0xff]  ;;  %v3803_v18 = vld [vmem:[%s4384_s1 + $0x20] sm:$0xff]  ;;  %v134_v20 = vld [vmem:[%s4387_s4 + $0x38] sm:$0x3f]  ;;  %p3550_p13 = scmp.lt.s32.totalorder %s2319_s12, %s2319_s12 }
  0x62   :  { %2610 = vmatprep.subr.bf16.mxu0 %v3586_v14  ;;  %v129_v21 = vld [vmem:[%s4387_s4 + $0x10] sm:$0xff]  ;;  %v3825_v23 = vld [vmem:[%s4384_s1 + $0x18] sm:$0xff]  ;;  %v2604_v24 = vpack.c.bf16 %v134_v20, %v130_v19  ;;  %v603_v26 = vld [vmem:[#allocation2] sm:$0xff] }
  0x63   :  { %v133_v22 = vld [vmem:[%s4387_s4 + $0x30] sm:$0x3f]  ;;  %v607_v27 = vld [vmem:[#allocation2 + $0x20] sm:$0xff]  ;;  %v3831_v28 = vld [vmem:[%s4384_s1 + $0x28] sm:$0xff] }
  0x64   :  { %2331 = vmatmul.mubr.msk.f32.vlgmr.msra.gmra.mrb[0].mxu0 %vm157_vm4, %v3775_v12  ;;  %2335 = vmatmul.mubr.msk.f32.vlgmr.msra.gmra.mrb[0].mxu1 %vm157_vm4, %v3803_v18  ;;  %v2607_v25 = vpack.c.bf16 %v133_v22, %v129_v21  ;;  %v612_v29 = vld [vmem:[#allocation2 + $0x48] sm:$0xff]  ;;  %v421_v31 = vld [vmem:[%s4383_s0] sm:$0xff]  ;;  %v3844_v32 = vpack.c.bf16 %v607_v27, %v603_v26  ;;  %v3855_v38 = vld [vmem:[%s4384_s1 + $0x30] sm:$0xff] }
  0x65   :  { %2613 = vmatpush3.bf16.msk.msra.mxu0 %vm2612_vm5, %v2611_v13  ;;  %265 = vmatprep.mubr.f32.mxu0 %v3584_v0  ;;  %v616_v30 = vld [vmem:[#allocation2 + $0x68] sm:$0xff]  ;;  %v611_v34 = vld [vmem:[#allocation2 + $0x40] sm:$0xff]  ;;  %v3870_v45 = vld [vmem:[%s4384_s1 + $0x38] sm:$0xff] }
  0x66   :  { %2639 = vmatprep.subr.bf16.mxu0 %v3781_v15  ;;  %289 = vmatprep.mubr.f32.mxu1 %v3584_v0  ;;  %v3848_v33 = vpack.c.bf16 %v616_v30, %v612_v29  ;;  %v615_v35 = vld [vmem:[#allocation2 + $0x60] sm:$0xff]  ;;  %v620_v36 = vld [vmem:[#allocation2 + $0x88] sm:$0xff]  ;;  %v512_v55 = vld [vmem:[#allocation5 + $0x10] sm:$0xff] }
  0x67   :  { %2606 = vmatprep.subr.msk.bf16.mxu1 %vm3744_vm2, %v2604_v24  ;;  %v624_v37 = vld [vmem:[#allocation2 + $0xa8] sm:$0xff]  ;;  %v3858_v39 = vpack.c.bf16 %v615_v35, %v611_v34  ;;  %v619_v41 = vld [vmem:[#allocation2 + $0x80] sm:$0xff]  ;;  %v513_v56 = vld [vmem:[#allocation5 + $0x18] sm:$0xff] }
  0x68   :  { %2332 = vmatmul.mubr.msk.f32.gmra.mrb[2].mxu0 %vm157_vm4, %v3789_v16  ;;  %2609 = vmatpush1.bf16.msk.msra.mxu1 %vm3744_vm2, %v2607_v25  ;;  %v3862_v40 = vpack.c.bf16 %v624_v37, %v620_v36  ;;  %v623_v42 = vld [vmem:[#allocation2 + $0xa0] sm:$0xff]  ;;  %v628_v43 = vld [vmem:[#allocation2 + $0xc8] sm:$0xff]  ;;  %v2618_v63 = vpack.c.bf16 %v513_v56, %v512_v55  ;;  %v516_v10 = vld [vmem:[#allocation5 + $0x30] sm:$0xff] }
  0x69   :  { %271 = vmatprep.mubr.f32.mxu0 %v3584_v0  ;;  %2336 = vmatmul.mubr.msk.f32.gmra.mrb[2].mxu1 %vm157_vm4, %v3831_v28  ;;  %v632_v44 = vld [vmem:[#allocation2 + $0xe8] sm:$0xff]  ;;  %v510_v46 = vld [vmem:[#allocation5] sm:$0xff]  ;;  %v3873_v48 = vpack.c.bf16 %v623_v42, %v619_v41  ;;  %v517_v11 = vld [vmem:[#allocation5 + $0x38] sm:$0xff] }
  0x6a   :  { %295 = vmatprep.mubr.f32.mxu1 %v3584_v0  ;;  %2614 = vmatprep.subr.bf16.mxu1 %v3586_v14  ;;  %v511_v47 = vld [vmem:[#allocation5 + $0x8] sm:$0xff]  ;;  %v3876_v49 = vpack.c.bf16 %v632_v44, %v628_v43  ;;  %v627_v50 = vld [vmem:[#allocation2 + $0xc0] sm:$0xff]  ;;  %v2624_v22 = vpack.c.bf16 %v517_v11, %v516_v10  ;;  %v521_v34 = vld [vmem:[#allocation5 + $0x58] sm:$0xff] }
  0x6b   :  { %v631_v51 = vld [vmem:[#allocation2 + $0xe0] sm:$0xff]  ;;  %v636_v52 = vld [vmem:[#allocation2 + $0x108] sm:$0xff]  ;;  %v2615_v54 = vpack.c.bf16 %v511_v47, %v510_v46  ;;  %v606_v42 = vld [vmem:[#allocation2 + $0x18] sm:$0xff] }
  0x6c   :  { %2333 = vmatmul.mubr.msk.f32.gmra.mrb[4].mxu0 %vm157_vm4, %v3798_v17  ;;  %v640_v53 = vld [vmem:[#allocation2 + $0x128] sm:$0xff]  ;;  %v3882_v57 = vpack.c.bf16 %v631_v51, %v627_v50  ;;  %v635_v59 = vld [vmem:[#allocation2 + $0x100] sm:$0xff]  ;;  %v610_v43 = vld [vmem:[#allocation2 + $0x38] sm:$0xff] }
  0x6d   :  { %277 = vmatprep.mubr.f32.mxu0 %v3584_v0  ;;  %2337 = vmatmul.mubr.msk.f32.gmra.mrb[4].mxu1 %vm157_vm4, %v3855_v38  ;;  %v3885_v58 = vpack.c.bf16 %v640_v53, %v636_v52  ;;  %v639_v60 = vld [vmem:[#allocation2 + $0x120] sm:$0xff]  ;;  %v644_v61 = vld [vmem:[#allocation2 + $0x148] sm:$0xff]  ;;  %v3961_v44 = vpack.c.bf16 %v610_v43, %v606_v42  ;;  %v605_v52 = vld [vmem:[#allocation2 + $0x10] sm:$0xff] }
  0x6e   :  { %301 = vmatprep.mubr.f32.mxu1 %v3584_v0  ;;  %v648_v62 = vld [vmem:[#allocation2 + $0x168] sm:$0xff]  ;;  %v514_v1 = vld [vmem:[#allocation5 + $0x20] sm:$0xff]  ;;  %v3892_v3 = vpack.c.bf16 %v639_v60, %v635_v59  ;;  %v609_v53 = vld [vmem:[#allocation2 + $0x30] sm:$0xff] }
  0x6f   :  { %v515_v2 = vld [vmem:[#allocation5 + $0x28] sm:$0xff]  ;;  %v3895_v4 = vpack.c.bf16 %v648_v62, %v644_v61  ;;  %v643_v5 = vld [vmem:[#allocation2 + $0x140] sm:$0xff]  ;;  %v614_v55 = vld [vmem:[#allocation2 + $0x58] sm:$0xff]  ;;  %v3975_v61 = vpack.c.bf16 %v609_v53, %v605_v52 }
  0x70   :  { %2334 = vmatmul.mubr.msk.f32.gmra.mrb[6].mxu0 %vm157_vm4, %v3825_v23  ;;  %v647_v6 = vld [vmem:[#allocation2 + $0x160] sm:$0xff]  ;;  %v652_v7 = vld [vmem:[#allocation2 + $0x188] sm:$0xff]  ;;  %v2621_v9 = vpack.c.bf16 %v515_v2, %v514_v1  ;;  %v618_v56 = vld [vmem:[#allocation2 + $0x78] sm:$0xff] }
  0x71   :  { %2455 = vmatprep.mubr.msk.f32.mxu0 %vm3587_vm6, %v3584_v0  ;;  %2338 = vmatmul.mubr.msk.f32.gmra.mrb[6].mxu1 %vm157_vm4, %v3870_v45  ;;  %v656_v8 = vld [vmem:[#allocation2 + $0x1a8] sm:$0xff]  ;;  %v651_v19 = vld [vmem:[#allocation2 + $0x180] sm:$0xff]  ;;  %v3979_v1 = vpack.c.bf16 %v618_v56, %v614_v55  ;;  %v613_v2 = vld [vmem:[#allocation2 + $0x50] sm:$0xff] }
  0x72   :  { %372 = vmatprep.mubr.f32.mxu1 %v3584_v0  ;;  %v3905_v13 = vpack.c.bf16 %v656_v8, %v652_v7  ;;  %v660_v20 = vld [vmem:[#allocation2 + $0x1c8] sm:$0xff]  ;;  %v518_v24 = vld [vmem:[#allocation5 + $0x40] sm:$0xff]  ;;  %v622_v7 = vld [vmem:[#allocation2 + $0x98] sm:$0xff] }
  0x73   :  { %v664_v21 = vld [vmem:[#allocation2 + $0x1e8] sm:$0xff]  ;;  %v659_v29 = vld [vmem:[#allocation2 + $0x1c0] sm:$0xff]  ;;  %v626_v8 = vld [vmem:[#allocation2 + $0xb8] sm:$0xff] }
  0x74   :  { %2456 = vmatmul.mubr.msk.f32.vlgmr.msra.gmra.mrb[8].mxu0 %vm431_vm7, %v421_v31  ;;  %v519_v25 = vld [vmem:[#allocation5 + $0x48] sm:$0xff]  ;;  %v3915_v27 = vpack.c.bf16 %v664_v21, %v660_v20  ;;  %v520_v31 = vld [vmem:[#allocation5 + $0x50] sm:$0xff]  ;;  %v522_v36 = vld [vmem:[#allocation5 + $0x60] sm:$0xff]  ;;  %v3990_v11 = vpack.c.bf16 %v626_v8, %v622_v7 }
  0x75   :  { %2641 = vmatpush1.bf16.msra.mxu0 %v3844_v32  ;;  %731 = vmatprep.mubr.f32.mxu0 %v3584_v0  ;;  %v2627_v30 = vpack.c.bf16 %v519_v25, %v518_v24  ;;  %v523_v37 = vld [vmem:[#allocation5 + $0x68] sm:$0xff]  ;;  %v2349_v50 = vld [vmem:[%s4386_s3] ss:$0 sm:$0xff]  ;;  %v630_v21 = vld [vmem:[#allocation2 + $0xd8] sm:$0xff] }
  0x76   :  { %2643 = vmatprep.subr.bf16.mxu0 %v3848_v33  ;;  %2341 = vmatmul.mubr.msk.f32.vlgmr.msra.gmra.mrb[8].mxu1 %vm157_vm4, %v3775_v12  ;;  %v3902_v12 = vpack.c.bf16 %v647_v6, %v643_v5  ;;  %v2633_v41 = vpack.c.bf16 %v523_v37, %v522_v36  ;;  %v617_v5 = vld [vmem:[#allocation2 + $0x70] sm:$0xff]  ;;  %v658_v52 = vld [vmem:[#allocation2 + $0x1b8] sm:$0xff] }
  0x77   :  { %2616 = vmatpush3.bf16.msra.mxu1 %v2615_v54  ;;  %378 = vmatprep.mubr.f32.mxu1 %v3584_v0  ;;  %v637_v36 = vld [vmem:[#allocation2 + $0x110] sm:$0xff] }
  0x78   :  { %2617 = vmatprep.subr.bf16.mxu1 %v3586_v14  ;;  %v641_v37 = vld [vmem:[#allocation2 + $0x130] sm:$0xff] }
  0x79   :  { %2645 = vmatpush1.bf16.msra.mxu0 %v3858_v39  ;;  %v645_v42 = vld [vmem:[#allocation2 + $0x150] sm:$0xff] }
  0x7a   :  { %2647 = vmatprep.subr.bf16.mxu0 %v3862_v40  ;;  %2342 = vmatmul.mubr.msk.f32.gmra.mrb[10].mxu1 %vm157_vm4, %v3789_v16  ;;  %v655_v16 = vld [vmem:[#allocation2 + $0x1a0] sm:$0xff]  ;;  %v649_v43 = vld [vmem:[#allocation2 + $0x170] sm:$0xff] }
  0x7b   :  { %2619 = vmatpush3.bf16.msra.mxu1 %v2618_v63  ;;  %384 = vmatprep.mubr.f32.mxu1 %v3584_v0  ;;  %v3912_v26 = vpack.c.bf16 %v655_v16, %v651_v19  ;;  %v621_v19 = vld [vmem:[#allocation2 + $0x90] sm:$0xff]  ;;  %v4013_v53 = vpack.c.bf16 %v649_v43, %v645_v42 }
  0x7c   :  { %2620 = vmatprep.subr.bf16.mxu1 %v3586_v14  ;;  %v625_v16 = vld [vmem:[#allocation2 + $0xb0] sm:$0xff] }
  0x7d   :  { %2649 = vmatpush1.bf16.msra.mxu0 %v3873_v48  ;;  %v3995_v24 = vpack.c.bf16 %v625_v16, %v621_v19  ;;  %v653_v55 = vld [vmem:[#allocation2 + $0x190] sm:$0xff] }
  0x7e   :  { %2651 = vmatprep.subr.bf16.mxu0 %v3876_v49  ;;  %2343 = vmatmul.mubr.msk.f32.gmra.mrb[12].mxu1 %vm157_vm4, %v3798_v17  ;;  %v663_v17 = vld [vmem:[#allocation2 + $0x1e0] sm:$0xff]  ;;  %v657_v56 = vld [vmem:[#allocation2 + $0x1b0] sm:$0xff] }
  0x7f   :  { %2622 = vmatpush3.bf16.msra.mxu1 %v2621_v9  ;;  %390 = vmatprep.mubr.f32.mxu1 %v3584_v0  ;;  %v3922_v35 = vpack.c.bf16 %v663_v17, %v659_v29  ;;  %v3984_v9 = vpack.c.bf16 %v617_v5, %v613_v2  ;;  %v629_v29 = vld [vmem:[#allocation2 + $0xd0] sm:$0xff] }
  0x80   :  { %2623 = vmatprep.subr.bf16.mxu1 %v3586_v14  ;;  %v633_v17 = vld [vmem:[#allocation2 + $0xf0] sm:$0xff] }
  0x81   :  { %2653 = vmatpush1.bf16.msra.mxu0 %v3882_v57  ;;  %v661_v5 = vld [vmem:[#allocation2 + $0x1d0] sm:$0xff] }
  0x82   :  { %2655 = vmatprep.subr.bf16.mxu0 %v3885_v58  ;;  %2344 = vmatmul.mubr.msk.f32.gmra.mrb[14].mxu1 %vm157_vm4, %v3825_v23  ;;  %v2630_v23 = vpack.c.bf16 %v521_v34, %v520_v31  ;;  %v642_v31 = vld [vmem:[#allocation2 + $0x138] sm:$0xff]  ;;  %v4001_v34 = vpack.c.bf16 %v633_v17, %v629_v29  ;;  %v665_v7 = vld [vmem:[#allocation2 + $0x1f0] sm:$0xff]  ;;  %v135_v17 = vld [vmem:[%s4389_s6] sm:$0xf] }
  0x83   :  { %2625 = vmatpush3.bf16.msra.mxu1 %v2624_v22  ;;  %396 = vmatprep.mubr.f32.mxu1 %v3584_v0  ;;  %v634_v22 = vld [vmem:[#allocation2 + $0xf8] sm:$0xff]  ;;  %v4025_v8 = vpack.c.bf16 %v665_v7, %v661_v5 }
  0x84   :  { %2626 = vmatprep.subr.bf16.mxu1 %v3586_v14  ;;  %v3998_v25 = vpack.c.bf16 %v634_v22, %v630_v21  ;;  %v137_v21 = vlaneseq }
  0x85   :  { %2657 = vmatpush1.bf16.msra.mxu0 %v3892_v3 }
  0x86   :  { %2659 = vmatprep.subr.bf16.mxu0 %v3895_v4  ;;  %2345 = vmatmul.mubr.msk.f32.gmra.mrb[16].mxu1 %vm157_vm4, %v3803_v18  ;;  %v524_v18 = vld [vmem:[#allocation5 + $0x70] sm:$0xff]  ;;  %v138_v22 = vshrl.u32 %v137_v21, 7 }
  0x87   :  { %2628 = vmatpush3.bf16.msra.mxu1 %v2627_v30  ;;  %402 = vmatprep.mubr.f32.mxu1 %v3584_v0  ;;  %v638_v30 = vld [vmem:[#allocation2 + $0x118] sm:$0xff] }
  0x88   :  { %2629 = vmatprep.subr.bf16.mxu1 %v3586_v14  ;;  %v143_v29 = vsub.s32 1, %v138_v22  ;;  %v147_v43 = vsub.s32 2, %v138_v22 }
  0x89   :  { %2661 = vmatpush1.bf16.msra.mxu0 %v3902_v12 }
  0x8a   :  { %2663 = vmatprep.subr.bf16.mxu0 %v3905_v13  ;;  %2346 = vmatmul.mubr.msk.f32.gmra.mrb[18].mxu1 %vm157_vm4, %v3831_v28  ;;  %v525_v28 = vld [vmem:[#allocation5 + $0x78] sm:$0xff] }
  0x8b   :  { %2631 = vmatpush3.bf16.msra.mxu1 %v2630_v23  ;;  %408 = vmatprep.mubr.f32.mxu1 %v3584_v0  ;;  %v4004_v23 = vpack.c.bf16 %v642_v31, %v638_v30  ;;  %v139_v30 = vsub.s32 0, %v138_v22  ;;  %v4051_v31 = vrot.slane %v135_v17, %v143_v29 }
  0x8c   :  { %2632 = vmatprep.subr.bf16.mxu1 %v3586_v14 }
  0x8d   :  { %2665 = vmatpush1.bf16.msra.mxu0 %v3912_v26 }
  0x8e   :  { %2667 = vmatprep.subr.bf16.mxu0 %v3915_v27  ;;  %2347 = vmatmul.mubr.msk.f32.gmra.mrb[20].mxu1 %vm157_vm4, %v3855_v38  ;;  %v2636_v38 = vpack.c.bf16 %v525_v28, %v524_v18  ;;  %v650_v18 = vld [vmem:[#allocation2 + $0x178] sm:$0xff]  ;;  %v4007_v28 = vpack.c.bf16 %v641_v37, %v637_v36  ;;  %v4053_v36 = vrot.slane %v135_v17, %v139_v30 }
  0x8f   :  { %2634 = vmatpush3.bf16.msra.mxu1 %v2633_v41  ;;  %414 = vmatprep.mubr.f32.mxu1 %v3584_v0  ;;  %v646_v41 = vld [vmem:[#allocation2 + $0x158] sm:$0xff] }
  0x90   :  { %2635 = vmatprep.subr.bf16.mxu1 %v3586_v14 }
  0x91   :  { %2669 = vmatpush1.bf16.msra.mxu0 %v3922_v35 }
  0x92   :  { %2703 = vmatprep.subr.bf16.mxu0 %v3781_v15  ;;  %2348 = vmatmul.mubr.msk.f32.gmra.mrb[22].mxu1 %vm157_vm4, %v3870_v45 }
  0x93   :  { %2490 = vmatprep.mubr.msk.f32.mxu1 %vm3587_vm6, %v3584_v0  ;;  %2637 = vmatpush3.bf16.msra.mxu1 %v2636_v38  ;;  %v4010_v38 = vpack.c.bf16 %v650_v18, %v646_v41 }
  0x94   :  { %732 = vmatmul.mubr.f32.vlgmr.msra.gmra.mrb[0].mxu0 %v3584_v0  ;;  %2671 = vmatprep.subr.bf16.mxu1 %v3961_v44 }
  0x95   :  { %2705 = vmatpush1.bf16.msra.mxu0 %v3844_v32  ;;  %901 = vmatprep.mubr.f32.mxu0 %v3584_v0 }
  0x96   :  { %2707 = vmatprep.subr.bf16.mxu0 %v3848_v33 }
  0x99   :  { %2709 = vmatpush1.bf16.msra.mxu0 %v3858_v39 }
  0x9a   :  { %2711 = vmatprep.subr.bf16.mxu0 %v3862_v40 }
  0x9d   :  { %2713 = vmatpush1.bf16.msra.mxu0 %v3873_v48 }
  0x9e   :  { %2715 = vmatprep.subr.bf16.mxu0 %v3876_v49 }
  0xa1   :  { %2717 = vmatpush1.bf16.msra.mxu0 %v3882_v57 }
  0xa2   :  { %2719 = vmatprep.subr.bf16.mxu0 %v3885_v58 }
  0xa5   :  { %2721 = vmatpush1.bf16.msra.mxu0 %v3892_v3 }
  0xa6   :  { %2723 = vmatprep.subr.bf16.mxu0 %v3895_v4 }
  0xa9   :  { %2725 = vmatpush1.bf16.msra.mxu0 %v3902_v12 }
  0xaa   :  { %2727 = vmatprep.subr.bf16.mxu0 %v3905_v13 }
  0xad   :  { %2729 = vmatpush1.bf16.msra.mxu0 %v3912_v26 }
  0xae   :  { %2731 = vmatprep.subr.bf16.mxu0 %v3915_v27 }
  0xb1   :  { %2733 = vmatpush1.bf16.msra.mxu0 %v3922_v35 }
  0xb2   :  { %2767 = vmatprep.subr.bf16.mxu0 %v3781_v15 }
 0x137   :  { %v3964_v45 = vpop.f32.mrb[0].mxu1 }
 0x138   :  { %v3966_v46 = vpop.f32.mrb[1].mxu1 }
 0x13c   :  { %v3968_v47 = vpop.f32.mrb[2].mxu1 }
 0x13d   :  { %v3973_v51 = vpop.f32.mrb[3].mxu1 }
 0x140   :  { %v3977_v62 = vpop.f32.mrb[4].mxu1 }
 0x141   :  { %v3981_v6 = vpop.f32.mrb[5].mxu1 }
 0x144   :  { %v3987_v10 = vpop.f32.mrb[6].mxu1 }
 0x145   :  { %v3992_v20 = vpop.f32.mrb[7].mxu1 }
 0x147   :  { %v505_v54 = vpop.f32.mrb[8].mxu0 }
 0x148   :  { %v506_v59 = vadd.f32 %v2349_v50, %v505_v54  ;;  %v2457_v60 = vpop.f32.mrb[9].mxu0  ;;  %v654_v50 = vld [vmem:[#allocation2 + $0x198] sm:$0xff] }
 0x149   :  { %v4016_v54 = vpack.c.bf16 %v658_v52, %v654_v50  ;;  %v666_v60 = vld [vmem:[#allocation2 + $0x1f8] sm:$0xff]  ;;  %v151_v50 = vsub.s32 3, %v138_v22 }
 0x14a   :  { %v509_v63 = vmax.f32 %v506_v59, 0.0  ;;  %v662_v59 = vld [vmem:[#allocation2 + $0x1d8] sm:$0xff] }
 0x14b   :  { %v4022_v2 = vpack.c.bf16 %v666_v60, %v662_v59  ;;  %v4059_v60 = vrot.slane %v135_v17, %v151_v50 }
 0x14c   :  { %2491 = vmatmul.mubr.f32.vlgmr.msra.gmra.mrb[24].mxu1 %v509_v63  ;;  %v4019_v63 = vpack.c.bf16 %v657_v56, %v653_v55  ;;  %v4057_v56 = vrot.slane %v135_v17, %v147_v43 }
 0x14d   :  { %2673 = vmatpush1.bf16.msra.mxu1 %v3975_v61  ;;  %802 = vmatprep.mubr.f32.mxu1 %v3584_v0 }
 0x14e   :  { %2675 = vmatprep.subr.bf16.mxu1 %v3979_v1 }
 0x151   :  { %2677 = vmatpush1.bf16.msra.mxu1 %v3984_v9 }
 0x152   :  { %2679 = vmatprep.subr.bf16.mxu1 %v3990_v11 }
 0x155   :  { %2681 = vmatpush1.bf16.msra.mxu1 %v3995_v24 }
 0x156   :  { %2683 = vmatprep.subr.bf16.mxu1 %v3998_v25 }
 0x159   :  { %2685 = vmatpush1.bf16.msra.mxu1 %v4001_v34 }
 0x15a   :  { %2687 = vmatprep.subr.bf16.mxu1 %v4004_v23 }
 0x15d   :  { %2689 = vmatpush1.bf16.msra.mxu1 %v4007_v28 }
 0x15e   :  { %2691 = vmatprep.subr.bf16.mxu1 %v4010_v38 }
 0x161   :  { %2693 = vmatpush1.bf16.msra.mxu1 %v4013_v53 }
 0x162   :  { %2695 = vmatprep.subr.bf16.mxu1 %v4016_v54 }
 0x165   :  { %2697 = vmatpush1.bf16.msra.mxu1 %v4019_v63 }
 0x166   :  { %2699 = vmatprep.subr.bf16.mxu1 %v4022_v2 }
 0x167   :  { %v733_v19 = vpop.f32.mrb[0].mxu0 }
 0x168   :  { %v735_v16 = vpop.f32.mrb[1].mxu0  ;;  %v3224_v41 = vadd.f32 %v733_v19, %v4053_v36 }
 0x169   :  { %2701 = vmatpush1.bf16.msra.mxu1 %v4025_v8  ;;  %v3225_v37 = vadd.f32 %v735_v16, %v4051_v31 }
 0x16a   :  { %2735 = vmatprep.subr.bf16.mxu1 %v3961_v44  ;;  %v2353_v42 = vmul.f32 -1.442695, %v3224_v41 }
 0x16b   :  { %v2354_v18 = vmul.f32 -1.442695, %v3225_v37 }
 0x16c   :  { %803 = vmatmul.mubr.f32.vlgmr.msra.gmra.mrb[8].mxu1 %v3584_v0 }
 0x16d   :  { %2737 = vmatpush1.bf16.msra.mxu1 %v3975_v61  ;;  %972 = vmatprep.mubr.f32.mxu1 %v3584_v0  ;;  %3305 = vpow2.f32 %v2354_v18 }
 0x16e   :  { %2739 = vmatprep.subr.bf16.mxu1 %v3979_v1  ;;  %3307 = vpow2.f32 %v2353_v42 }
 0x171   :  { %2741 = vmatpush1.bf16.msra.mxu1 %v3984_v9 }
 0x172   :  { %2743 = vmatprep.subr.bf16.mxu1 %v3990_v11 }
 0x175   :  { %2745 = vmatpush1.bf16.msra.mxu1 %v3995_v24 }
 0x176   :  { %2747 = vmatprep.subr.bf16.mxu1 %v3998_v25 }
 0x177   :  { %v3306_v52 = vpop.eup %3305 }
 0x178   :  { %v3308_v55 = vpop.eup %3307  ;;  %v823_v59 = vadd.f32 1.0, %v3306_v52 }
 0x179   :  { %2749 = vmatpush1.bf16.msra.mxu1 %v4001_v34  ;;  %v822_v5 = vadd.f32 1.0, %v3308_v55 }
 0x17a   :  { %2751 = vmatprep.subr.bf16.mxu1 %v4004_v23  ;;  %3309 = vrcp.f32 %v823_v59 }
 0x17b   :  { %3311 = vrcp.f32 %v822_v5 }
 0x17d   :  { %2753 = vmatpush1.bf16.msra.mxu1 %v4007_v28 }
 0x17e   :  { %2755 = vmatprep.subr.bf16.mxu1 %v4010_v38 }
 0x181   :  { %2757 = vmatpush1.bf16.msra.mxu1 %v4013_v53 }
 0x182   :  { %2759 = vmatprep.subr.bf16.mxu1 %v4016_v54 }
 0x184   :  { %v3310_v22 = vpop.eup %3309 }
 0x185   :  { %2761 = vmatpush1.bf16.msra.mxu1 %v4019_v63  ;;  %v3312_v30 = vpop.eup %3311  ;;  %v832_v18 = vmul.f32 0.0, %v3310_v22 }
 0x186   :  { %2763 = vmatprep.subr.bf16.mxu1 %v4022_v2 }
 0x189   :  { %2765 = vmatpush1.bf16.msra.mxu1 %v4025_v8 }
 0x18a   :  { %2799 = vmatprep.subr.bf16.mxu1 %v3961_v44 }
 0x23f   :  { %v804_v7 = vpop.f32.mrb[8].mxu1 }
 0x240   :  { %v3248_v21 = vadd.f32 %v804_v7, %v4057_v56  ;;  %v806_v16 = vpop.f32.mrb[9].mxu1 }
 0x241   :  { %v3249_v19 = vadd.f32 %v806_v16, %v4059_v60 }
 0x242   :  { %v2355_v29 = vmul.f32 -1.442695, %v3248_v21 }
 0x243   :  { %3313 = vtanh.f32 %v3249_v19 }
 0x244   :  { %3315 = vpow2.f32 %v2355_v29 }
 0x24d   :  { %v3314_v37 = vpop.eup %3313 }
 0x24e   :  { %v3316_v41 = vpop.eup %3315  ;;  %v833_v42 = vmul.f32 %v3314_v37, %v3312_v30 }
 0x24f   :  { %v824_v17 = vadd.f32 1.0, %v3316_v41 }
 0x250   :  { %v4063_v43 = vadd.f32 %v833_v42, %v832_v18 }
 0x251   :  { %3317 = vrcp.f32 %v824_v17 }
 0x252   :  { %3319 = vtanh.f32 %v4063_v43 }
 0x25b   :  { %v3318_v50 = vpop.eup %3317 }
 0x25c   :  { %v3320_v52 = vpop.eup %3319 }
 0x25d   :  { %v836_v55 = vmul.f32 %v3320_v52, %v3318_v50 }
 0x25f   :  { %902 = vmatmul.mubr.f32.vlgmr.msra.gmra.mrb[2].mxu0 %v836_v55  ;;  %973 = vmatmul.mubr.f32.vlgmr.msra.gmra.mrb[10].mxu1 %v836_v55 }
 0x260   :  { %2769 = vmatpush1.bf16.msra.mxu0 %v3844_v32  ;;  %2801 = vmatpush1.bf16.msra.mxu1 %v3975_v61 }
 0x261   :  { %2771 = vmatprep.subr.bf16.mxu0 %v3848_v33  ;;  %2803 = vmatprep.subr.bf16.mxu1 %v3979_v1 }
 0x262   :  { %1071 = vmatprep.mubr.f32.mxu0 %v3584_v0  ;;  %1142 = vmatprep.mubr.f32.mxu1 %v3584_v0 }
 0x264   :  { %2773 = vmatpush1.bf16.msra.mxu0 %v3858_v39  ;;  %2805 = vmatpush1.bf16.msra.mxu1 %v3984_v9 }
 0x265   :  { %2775 = vmatprep.subr.bf16.mxu0 %v3862_v40  ;;  %2807 = vmatprep.subr.bf16.mxu1 %v3990_v11 }
 0x268   :  { %2777 = vmatpush1.bf16.msra.mxu0 %v3873_v48  ;;  %2809 = vmatpush1.bf16.msra.mxu1 %v3995_v24 }
 0x269   :  { %2779 = vmatprep.subr.bf16.mxu0 %v3876_v49  ;;  %2811 = vmatprep.subr.bf16.mxu1 %v3998_v25 }
 0x26c   :  { %2781 = vmatpush1.bf16.msra.mxu0 %v3882_v57  ;;  %2813 = vmatpush1.bf16.msra.mxu1 %v4001_v34 }
 0x26d   :  { %2783 = vmatprep.subr.bf16.mxu0 %v3885_v58  ;;  %2815 = vmatprep.subr.bf16.mxu1 %v4004_v23 }
 0x270   :  { %2785 = vmatpush1.bf16.msra.mxu0 %v3892_v3  ;;  %2817 = vmatpush1.bf16.msra.mxu1 %v4007_v28 }
 0x271   :  { %2787 = vmatprep.subr.bf16.mxu0 %v3895_v4  ;;  %2819 = vmatprep.subr.bf16.mxu1 %v4010_v38 }
 0x274   :  { %2789 = vmatpush1.bf16.msra.mxu0 %v3902_v12  ;;  %2821 = vmatpush1.bf16.msra.mxu1 %v4013_v53 }
 0x275   :  { %2791 = vmatprep.subr.bf16.mxu0 %v3905_v13  ;;  %2823 = vmatprep.subr.bf16.mxu1 %v4016_v54 }
 0x278   :  { %2793 = vmatpush1.bf16.msra.mxu0 %v3912_v26  ;;  %2825 = vmatpush1.bf16.msra.mxu1 %v4019_v63 }
 0x279   :  { %2795 = vmatprep.subr.bf16.mxu0 %v3915_v27  ;;  %2827 = vmatprep.subr.bf16.mxu1 %v4022_v2 }
 0x27c   :  { %2797 = vmatpush1.bf16.msra.mxu0 %v3922_v35  ;;  %2829 = vmatpush1.bf16.msra.mxu1 %v4025_v8 }
 0x27d   :  { %2831 = vmatprep.subr.bf16.mxu0 %v3781_v15  ;;  %2863 = vmatprep.subr.bf16.mxu1 %v3961_v44 }
 0x332   :  { %v903_v59 = vpop.f32.mrb[2].mxu0  ;;  %v974_v5 = vpop.f32.mrb[10].mxu1 }
 0x333   :  { %v3226_v7 = vadd.f32 %v903_v59, %v4053_v36  ;;  %v905_v21 = vpop.f32.mrb[3].mxu0  ;;  %v976_v16 = vpop.f32.mrb[11].mxu1  ;;  %v3250_v30 = vadd.f32 %v974_v5, %v4057_v56 }
 0x334   :  { %v3227_v19 = vadd.f32 %v905_v21, %v4051_v31  ;;  %v3251_v37 = vadd.f32 %v976_v16, %v4059_v60 }
 0x335   :  { %v2356_v29 = vmul.f32 -1.442695, %v3226_v7  ;;  %v2358_v41 = vmul.f32 -1.442695, %v3250_v30 }
 0x336   :  { %v2357_v22 = vmul.f32 -1.442695, %v3227_v19 }
 0x337   :  { %3321 = vpow2.f32 %v2356_v29 }
 0x338   :  { %3323 = vpow2.f32 %v2357_v22 }
 0x339   :  { %3325 = vtanh.f32 %v3251_v37 }
 0x33a   :  { %3327 = vpow2.f32 %v2358_v41 }
 0x341   :  { %v3322_v18 = vpop.eup %3321 }
 0x342   :  { %v992_v42 = vadd.f32 1.0, %v3322_v18  ;;  %v3324_v17 = vpop.eup %3323 }
 0x343   :  { %v993_v50 = vadd.f32 1.0, %v3324_v17  ;;  %v3326_v52 = vpop.eup %3325 }
 0x344   :  { %3329 = vrcp.f32 %v992_v42  ;;  %v3328_v55 = vpop.eup %3327 }
 0x345   :  { %3331 = vrcp.f32 %v993_v50  ;;  %v994_v19 = vadd.f32 1.0, %v3328_v55 }
 0x347   :  { %3333 = vrcp.f32 %v994_v19 }
 0x34e   :  { %v3330_v59 = vpop.eup %3329 }
 0x34f   :  { %v1003_v7 = vmul.f32 %v3330_v59, %v3326_v52  ;;  %v3332_v21 = vpop.eup %3331 }
 0x350   :  { %v1002_v29 = vmul.f32 %v3332_v21, %v4063_v43 }
 0x351   :  { %v3334_v16 = vpop.eup %3333 }
 0x352   :  { %v4105_v5 = vadd.f32 %v1003_v7, %v1002_v29 }
 0x354   :  { %3335 = vtanh.f32 %v4105_v5 }
 0x35e   :  { %v3336_v22 = vpop.eup %3335 }
 0x35f   :  { %v1006_v30 = vmul.f32 %v3336_v22, %v3334_v16 }
 0x361   :  { %1072 = vmatmul.mubr.f32.vlgmr.msra.gmra.mrb[4].mxu0 %v1006_v30  ;;  %1143 = vmatmul.mubr.f32.vlgmr.msra.gmra.mrb[12].mxu1 %v1006_v30 }
 0x362   :  { %2833 = vmatpush1.bf16.msra.mxu0 %v3844_v32  ;;  %2865 = vmatpush1.bf16.msra.mxu1 %v3975_v61 }
 0x363   :  { %2835 = vmatprep.subr.bf16.mxu0 %v3848_v33  ;;  %2867 = vmatprep.subr.bf16.mxu1 %v3979_v1 }
 0x364   :  { %1241 = vmatprep.mubr.f32.mxu0 %v3584_v0  ;;  %1312 = vmatprep.mubr.f32.mxu1 %v3584_v0 }
 0x366   :  { %2837 = vmatpush1.bf16.msra.mxu0 %v3858_v39  ;;  %2869 = vmatpush1.bf16.msra.mxu1 %v3984_v9 }
 0x367   :  { %2839 = vmatprep.subr.bf16.mxu0 %v3862_v40  ;;  %2871 = vmatprep.subr.bf16.mxu1 %v3990_v11 }
 0x36a   :  { %2841 = vmatpush1.bf16.msra.mxu0 %v3873_v48  ;;  %2873 = vmatpush1.bf16.msra.mxu1 %v3995_v24 }
 0x36b   :  { %2843 = vmatprep.subr.bf16.mxu0 %v3876_v49  ;;  %2875 = vmatprep.subr.bf16.mxu1 %v3998_v25 }
 0x36e   :  { %2845 = vmatpush1.bf16.msra.mxu0 %v3882_v57  ;;  %2877 = vmatpush1.bf16.msra.mxu1 %v4001_v34 }
 0x36f   :  { %2847 = vmatprep.subr.bf16.mxu0 %v3885_v58  ;;  %2879 = vmatprep.subr.bf16.mxu1 %v4004_v23 }
 0x372   :  { %2849 = vmatpush1.bf16.msra.mxu0 %v3892_v3  ;;  %2881 = vmatpush1.bf16.msra.mxu1 %v4007_v28 }
 0x373   :  { %2851 = vmatprep.subr.bf16.mxu0 %v3895_v4  ;;  %2883 = vmatprep.subr.bf16.mxu1 %v4010_v38 }
 0x376   :  { %2853 = vmatpush1.bf16.msra.mxu0 %v3902_v12  ;;  %2885 = vmatpush1.bf16.msra.mxu1 %v4013_v53 }
 0x377   :  { %2855 = vmatprep.subr.bf16.mxu0 %v3905_v13  ;;  %2887 = vmatprep.subr.bf16.mxu1 %v4016_v54 }
 0x37a   :  { %2857 = vmatpush1.bf16.msra.mxu0 %v3912_v26  ;;  %2889 = vmatpush1.bf16.msra.mxu1 %v4019_v63 }
 0x37b   :  { %2859 = vmatprep.subr.bf16.mxu0 %v3915_v27  ;;  %2891 = vmatprep.subr.bf16.mxu1 %v4022_v2 }
 0x37e   :  { %2861 = vmatpush1.bf16.msra.mxu0 %v3922_v35  ;;  %2893 = vmatpush1.bf16.msra.mxu1 %v4025_v8 }
 0x37f   :  { %2895 = vmatprep.subr.bf16.mxu0 %v3781_v15  ;;  %2927 = vmatprep.subr.bf16.mxu1 %v3961_v44 }
 0x434   :  { %v1073_v43 = vpop.f32.mrb[4].mxu0  ;;  %v1144_v37 = vpop.f32.mrb[12].mxu1 }
 0x435   :  { %v3228_v41 = vadd.f32 %v1073_v43, %v4053_v36  ;;  %v1075_v18 = vpop.f32.mrb[5].mxu0  ;;  %v1146_v42 = vpop.f32.mrb[13].mxu1  ;;  %v3252_v55 = vadd.f32 %v1144_v37, %v4057_v56 }
 0x436   :  { %v3229_v17 = vadd.f32 %v1075_v18, %v4051_v31  ;;  %v3253_v59 = vadd.f32 %v1146_v42, %v4059_v60 }
 0x437   :  { %v2359_v50 = vmul.f32 -1.442695, %v3228_v41  ;;  %v2361_v7 = vmul.f32 -1.442695, %v3252_v55 }
 0x438   :  { %v2360_v52 = vmul.f32 -1.442695, %v3229_v17 }
 0x439   :  { %3337 = vpow2.f32 %v2359_v50 }
 0x43a   :  { %3339 = vpow2.f32 %v2360_v52 }
 0x43b   :  { %3341 = vtanh.f32 %v3253_v59 }
 0x43c   :  { %3343 = vpow2.f32 %v2361_v7 }
 0x443   :  { %v3338_v21 = vpop.eup %3337 }
 0x444   :  { %v1162_v19 = vadd.f32 1.0, %v3338_v21  ;;  %v3340_v29 = vpop.eup %3339 }
 0x445   :  { %v1163_v16 = vadd.f32 1.0, %v3340_v29  ;;  %v3342_v22 = vpop.eup %3341 }
 0x446   :  { %3345 = vrcp.f32 %v1162_v19  ;;  %v3344_v30 = vpop.eup %3343 }
 0x447   :  { %3347 = vrcp.f32 %v1163_v16  ;;  %v1164_v17 = vadd.f32 1.0, %v3344_v30 }
 0x449   :  { %3349 = vrcp.f32 %v1164_v17 }
 0x450   :  { %v3346_v43 = vpop.eup %3345 }
 0x451   :  { %v1173_v41 = vmul.f32 %v3346_v43, %v3342_v22  ;;  %v3348_v18 = vpop.eup %3347 }
 0x452   :  { %v1172_v50 = vmul.f32 %v3348_v18, %v4105_v5 }
 0x453   :  { %v3350_v42 = vpop.eup %3349 }
 0x454   :  { %v4147_v37 = vadd.f32 %v1173_v41, %v1172_v50 }
 0x456   :  { %3351 = vtanh.f32 %v4147_v37 }
 0x460   :  { %v3352_v52 = vpop.eup %3351 }
 0x461   :  { %v1176_v55 = vmul.f32 %v3352_v52, %v3350_v42 }
 0x463   :  { %1242 = vmatmul.mubr.f32.vlgmr.msra.gmra.mrb[6].mxu0 %v1176_v55  ;;  %1313 = vmatmul.mubr.f32.vlgmr.msra.gmra.mrb[14].mxu1 %v1176_v55 }
 0x464   :  { %2897 = vmatpush1.bf16.msra.mxu0 %v3844_v32  ;;  %2929 = vmatpush1.bf16.msra.mxu1 %v3975_v61 }
 0x465   :  { %2899 = vmatprep.subr.bf16.mxu0 %v3848_v33  ;;  %2931 = vmatprep.subr.bf16.mxu1 %v3979_v1 }
 0x466   :  { %1411 = vmatprep.mubr.f32.mxu0 %v3584_v0  ;;  %1482 = vmatprep.mubr.f32.mxu1 %v3584_v0 }
 0x468   :  { %2901 = vmatpush1.bf16.msra.mxu0 %v3858_v39  ;;  %2933 = vmatpush1.bf16.msra.mxu1 %v3984_v9 }
 0x469   :  { %2903 = vmatprep.subr.bf16.mxu0 %v3862_v40  ;;  %2935 = vmatprep.subr.bf16.mxu1 %v3990_v11 }
 0x46c   :  { %2905 = vmatpush1.bf16.msra.mxu0 %v3873_v48  ;;  %2937 = vmatpush1.bf16.msra.mxu1 %v3995_v24 }
 0x46d   :  { %2907 = vmatprep.subr.bf16.mxu0 %v3876_v49  ;;  %2939 = vmatprep.subr.bf16.mxu1 %v3998_v25 }
 0x470   :  { %2909 = vmatpush1.bf16.msra.mxu0 %v3882_v57  ;;  %2941 = vmatpush1.bf16.msra.mxu1 %v4001_v34 }
 0x471   :  { %2911 = vmatprep.subr.bf16.mxu0 %v3885_v58  ;;  %2943 = vmatprep.subr.bf16.mxu1 %v4004_v23 }
 0x474   :  { %2913 = vmatpush1.bf16.msra.mxu0 %v3892_v3  ;;  %2945 = vmatpush1.bf16.msra.mxu1 %v4007_v28 }
 0x475   :  { %2915 = vmatprep.subr.bf16.mxu0 %v3895_v4  ;;  %2947 = vmatprep.subr.bf16.mxu1 %v4010_v38 }
 0x478   :  { %2917 = vmatpush1.bf16.msra.mxu0 %v3902_v12  ;;  %2949 = vmatpush1.bf16.msra.mxu1 %v4013_v53 }
 0x479   :  { %2919 = vmatprep.subr.bf16.mxu0 %v3905_v13  ;;  %2951 = vmatprep.subr.bf16.mxu1 %v4016_v54 }
 0x47c   :  { %2921 = vmatpush1.bf16.msra.mxu0 %v3912_v26  ;;  %2953 = vmatpush1.bf16.msra.mxu1 %v4019_v63 }
 0x47d   :  { %2923 = vmatprep.subr.bf16.mxu0 %v3915_v27  ;;  %2955 = vmatprep.subr.bf16.mxu1 %v4022_v2 }
 0x480   :  { %2925 = vmatpush1.bf16.msra.mxu0 %v3922_v35  ;;  %2957 = vmatpush1.bf16.msra.mxu1 %v4025_v8 }
 0x481   :  { %2959 = vmatprep.subr.bf16.mxu0 %v3781_v15  ;;  %2991 = vmatprep.subr.bf16.mxu1 %v3961_v44 }
 0x536   :  { %v1243_v5 = vpop.f32.mrb[6].mxu0  ;;  %v1314_v59 = vpop.f32.mrb[14].mxu1 }
 0x537   :  { %v3230_v7 = vadd.f32 %v1243_v5, %v4053_v36  ;;  %v1245_v21 = vpop.f32.mrb[7].mxu0  ;;  %v1316_v19 = vpop.f32.mrb[15].mxu1  ;;  %v3254_v30 = vadd.f32 %v1314_v59, %v4057_v56 }
 0x538   :  { %v3231_v29 = vadd.f32 %v1245_v21, %v4051_v31  ;;  %v3255_v43 = vadd.f32 %v1316_v19, %v4059_v60 }
 0x539   :  { %v2362_v16 = vmul.f32 -1.442695, %v3230_v7  ;;  %v2364_v41 = vmul.f32 -1.442695, %v3254_v30 }
 0x53a   :  { %v2363_v22 = vmul.f32 -1.442695, %v3231_v29 }
 0x53b   :  { %3353 = vpow2.f32 %v2362_v16 }
 0x53c   :  { %3355 = vpow2.f32 %v2363_v22 }
 0x53d   :  { %3357 = vtanh.f32 %v3255_v43  ;;  %v288_v43 = vadd.f32 %v3966_v46, %v4051_v31 }
 0x53e   :  { %3359 = vpow2.f32 %v2364_v41 }
 0x545   :  { %v3354_v18 = vpop.eup %3353 }
 0x546   :  { %v1332_v17 = vadd.f32 1.0, %v3354_v18  ;;  %v3356_v50 = vpop.eup %3355 }
 0x547   :  { %v1333_v42 = vadd.f32 1.0, %v3356_v50  ;;  %v3358_v52 = vpop.eup %3357 }
 0x548   :  { %3361 = vrcp.f32 %v1332_v17  ;;  %v3360_v55 = vpop.eup %3359 }
 0x549   :  { %3363 = vrcp.f32 %v1333_v42  ;;  %v1334_v29 = vadd.f32 1.0, %v3360_v55 }
 0x54b   :  { %3365 = vrcp.f32 %v1334_v29 }
 0x552   :  { %v3362_v5 = vpop.eup %3361 }
 0x553   :  { %v1343_v7 = vmul.f32 %v3362_v5, %v3358_v52  ;;  %v3364_v21 = vpop.eup %3363 }
 0x554   :  { %v1342_v16 = vmul.f32 %v3364_v21, %v4147_v37  ;;  %v286_v37 = vadd.f32 %v3964_v45, %v4053_v36 }
 0x555   :  { %v3366_v19 = vpop.eup %3365 }
 0x556   :  { %v4189_v59 = vadd.f32 %v1343_v7, %v1342_v16 }
 0x558   :  { %3367 = vtanh.f32 %v4189_v59 }
 0x562   :  { %v3368_v22 = vpop.eup %3367 }
 0x563   :  { %v1346_v30 = vmul.f32 %v3368_v22, %v3366_v19 }
 0x565   :  { %1412 = vmatmul.mubr.f32.vlgmr.msra.gmra.mrb[10].mxu0 %v1346_v30  ;;  %1483 = vmatmul.mubr.f32.vlgmr.msra.gmra.mrb[16].mxu1 %v1346_v30 }
 0x566   :  { %2961 = vmatpush1.bf16.msra.mxu0 %v3844_v32  ;;  %2993 = vmatpush1.bf16.msra.mxu1 %v3975_v61 }
 0x567   :  { %2963 = vmatprep.subr.bf16.mxu0 %v3848_v33  ;;  %2995 = vmatprep.subr.bf16.mxu1 %v3979_v1 }
 0x568   :  { %1581 = vmatprep.mubr.f32.mxu0 %v3584_v0  ;;  %1652 = vmatprep.mubr.f32.mxu1 %v3584_v0 }
 0x56a   :  { %2965 = vmatpush1.bf16.msra.mxu0 %v3858_v39  ;;  %2997 = vmatpush1.bf16.msra.mxu1 %v3984_v9 }
 0x56b   :  { %2967 = vmatprep.subr.bf16.mxu0 %v3862_v40  ;;  %2999 = vmatprep.subr.bf16.mxu1 %v3990_v11 }
 0x56e   :  { %2969 = vmatpush1.bf16.msra.mxu0 %v3873_v48  ;;  %3001 = vmatpush1.bf16.msra.mxu1 %v3995_v24 }
 0x56f   :  { %2971 = vmatprep.subr.bf16.mxu0 %v3876_v49  ;;  %3003 = vmatprep.subr.bf16.mxu1 %v3998_v25 }
 0x572   :  { %2973 = vmatpush1.bf16.msra.mxu0 %v3882_v57  ;;  %3005 = vmatpush1.bf16.msra.mxu1 %v4001_v34 }
 0x573   :  { %2975 = vmatprep.subr.bf16.mxu0 %v3885_v58  ;;  %3007 = vmatprep.subr.bf16.mxu1 %v4004_v23 }
 0x576   :  { %2977 = vmatpush1.bf16.msra.mxu0 %v3892_v3  ;;  %3009 = vmatpush1.bf16.msra.mxu1 %v4007_v28 }
 0x577   :  { %2979 = vmatprep.subr.bf16.mxu0 %v3895_v4  ;;  %3011 = vmatprep.subr.bf16.mxu1 %v4010_v38 }
 0x57a   :  { %2981 = vmatpush1.bf16.msra.mxu0 %v3902_v12  ;;  %3013 = vmatpush1.bf16.msra.mxu1 %v4013_v53 }
 0x57b   :  { %2983 = vmatprep.subr.bf16.mxu0 %v3905_v13  ;;  %3015 = vmatprep.subr.bf16.mxu1 %v4016_v54 }
 0x57e   :  { %2985 = vmatpush1.bf16.msra.mxu0 %v3912_v26  ;;  %3017 = vmatpush1.bf16.msra.mxu1 %v4019_v63 }
 0x57f   :  { %2987 = vmatprep.subr.bf16.mxu0 %v3915_v27  ;;  %3019 = vmatprep.subr.bf16.mxu1 %v4022_v2 }
 0x582   :  { %2989 = vmatpush1.bf16.msra.mxu0 %v3922_v35  ;;  %3021 = vmatpush1.bf16.msra.mxu1 %v4025_v8 }
 0x583   :  { %3023 = vmatprep.subr.bf16.mxu0 %v3781_v15  ;;  %3055 = vmatprep.subr.bf16.mxu1 %v3961_v44 }
 0x638   :  { %v1413_v41 = vpop.f32.mrb[10].mxu0  ;;  %v1484_v18 = vpop.f32.mrb[16].mxu1 }
 0x639   :  { %v1489_v17 = vadd.f32 %v1413_v41, %v286_v37  ;;  %v1415_v50 = vpop.f32.mrb[11].mxu0  ;;  %v1486_v42 = vpop.f32.mrb[17].mxu1  ;;  %v3256_v7 = vadd.f32 %v1484_v18, %v4057_v56 }
 0x63a   :  { %v1490_v52 = vadd.f32 %v1415_v50, %v288_v43  ;;  %v3257_v21 = vadd.f32 %v1486_v42, %v4059_v60 }
 0x63b   :  { %v2365_v55 = vmul.f32 -1.442695, %v1489_v17  ;;  %v2367_v29 = vmul.f32 -1.442695, %v3256_v7 }
 0x63c   :  { %v2366_v5 = vmul.f32 -1.442695, %v1490_v52 }
 0x63d   :  { %3369 = vpow2.f32 %v2365_v55 }
 0x63e   :  { %3371 = vpow2.f32 %v2366_v5  ;;  %v294_v5 = vadd.f32 %v3973_v51, %v4051_v31 }
 0x63f   :  { %3373 = vtanh.f32 %v3257_v21 }
 0x640   :  { %3375 = vpow2.f32 %v2367_v29 }
 0x647   :  { %v3370_v16 = vpop.eup %3369 }
 0x648   :  { %v1502_v45 = vadd.f32 1.0, %v3370_v16  ;;  %v3372_v19 = vpop.eup %3371 }
 0x649   :  { %v1503_v46 = vadd.f32 1.0, %v3372_v19  ;;  %v3374_v22 = vpop.eup %3373 }
 0x64a   :  { %3377 = vrcp.f32 %v1502_v45  ;;  %v3376_v30 = vpop.eup %3375 }
 0x64b   :  { %3379 = vrcp.f32 %v1503_v46  ;;  %v1504_v17 = vadd.f32 1.0, %v3376_v30 }
 0x64d   :  { %3381 = vrcp.f32 %v1504_v17 }
 0x654   :  { %v3378_v37 = vpop.eup %3377 }
 0x655   :  { %v1513_v43 = vmul.f32 %v3378_v37, %v3374_v22  ;;  %v3380_v41 = vpop.eup %3379 }
 0x656   :  { %v1512_v50 = vmul.f32 %v3380_v41, %v4189_v59  ;;  %v292_v59 = vadd.f32 %v3968_v47, %v4053_v36 }
 0x657   :  { %v3382_v42 = vpop.eup %3381 }
 0x658   :  { %v4233_v18 = vadd.f32 %v1513_v43, %v1512_v50 }
 0x65a   :  { %3383 = vtanh.f32 %v4233_v18 }
 0x664   :  { %v3384_v52 = vpop.eup %3383 }
 0x665   :  { %v1516_v55 = vmul.f32 %v3384_v52, %v3382_v42 }
 0x667   :  { %1582 = vmatmul.mubr.f32.vlgmr.msra.gmra.mrb[12].mxu0 %v1516_v55  ;;  %1653 = vmatmul.mubr.f32.vlgmr.msra.gmra.mrb[18].mxu1 %v1516_v55 }
 0x668   :  { %3025 = vmatpush1.bf16.msra.mxu0 %v3844_v32  ;;  %3057 = vmatpush1.bf16.msra.mxu1 %v3975_v61 }
 0x669   :  { %3027 = vmatprep.subr.bf16.mxu0 %v3848_v33  ;;  %3059 = vmatprep.subr.bf16.mxu1 %v3979_v1 }
 0x66a   :  { %1751 = vmatprep.mubr.f32.mxu0 %v3584_v0  ;;  %1822 = vmatprep.mubr.f32.mxu1 %v3584_v0 }
 0x66c   :  { %3029 = vmatpush1.bf16.msra.mxu0 %v3858_v39  ;;  %3061 = vmatpush1.bf16.msra.mxu1 %v3984_v9 }
 0x66d   :  { %3031 = vmatprep.subr.bf16.mxu0 %v3862_v40  ;;  %3063 = vmatprep.subr.bf16.mxu1 %v3990_v11 }
 0x670   :  { %3033 = vmatpush1.bf16.msra.mxu0 %v3873_v48  ;;  %3065 = vmatpush1.bf16.msra.mxu1 %v3995_v24 }
 0x671   :  { %3035 = vmatprep.subr.bf16.mxu0 %v3876_v49  ;;  %3067 = vmatprep.subr.bf16.mxu1 %v3998_v25 }
 0x674   :  { %3037 = vmatpush1.bf16.msra.mxu0 %v3882_v57  ;;  %3069 = vmatpush1.bf16.msra.mxu1 %v4001_v34 }
 0x675   :  { %3039 = vmatprep.subr.bf16.mxu0 %v3885_v58  ;;  %3071 = vmatprep.subr.bf16.mxu1 %v4004_v23 }
 0x678   :  { %3041 = vmatpush1.bf16.msra.mxu0 %v3892_v3  ;;  %3073 = vmatpush1.bf16.msra.mxu1 %v4007_v28 }
 0x679   :  { %3043 = vmatprep.subr.bf16.mxu0 %v3895_v4  ;;  %3075 = vmatprep.subr.bf16.mxu1 %v4010_v38 }
 0x67c   :  { %3045 = vmatpush1.bf16.msra.mxu0 %v3902_v12  ;;  %3077 = vmatpush1.bf16.msra.mxu1 %v4013_v53 }
 0x67d   :  { %3047 = vmatprep.subr.bf16.mxu0 %v3905_v13  ;;  %3079 = vmatprep.subr.bf16.mxu1 %v4016_v54 }
 0x680   :  { %3049 = vmatpush1.bf16.msra.mxu0 %v3912_v26  ;;  %3081 = vmatpush1.bf16.msra.mxu1 %v4019_v63 }
 0x681   :  { %3051 = vmatprep.subr.bf16.mxu0 %v3915_v27  ;;  %3083 = vmatprep.subr.bf16.mxu1 %v4022_v2 }
 0x684   :  { %3053 = vmatpush1.bf16.msra.mxu0 %v3922_v35  ;;  %3085 = vmatpush1.bf16.msra.mxu1 %v4025_v8 }
 0x685   :  { %3087 = vmatprep.subr.bf16.mxu0 %v3781_v15  ;;  %3119 = vmatprep.subr.bf16.mxu1 %v3961_v44 }
 0x73a   :  { %v1583_v7 = vpop.f32.mrb[12].mxu0  ;;  %v1654_v21 = vpop.f32.mrb[18].mxu1 }
 0x73b   :  { %v1659_v29 = vadd.f32 %v1583_v7, %v292_v59  ;;  %v1585_v16 = vpop.f32.mrb[13].mxu0  ;;  %v1656_v45 = vpop.f32.mrb[19].mxu1  ;;  %v3258_v15 = vadd.f32 %v1654_v21, %v4057_v56 }
 0x73c   :  { %v1660_v19 = vadd.f32 %v1585_v16, %v294_v5  ;;  %v3259_v44 = vadd.f32 %v1656_v45, %v4059_v60  ;;  %v2031_v45 = vld [vmem:[#allocation7 + $0x20] sm:$0xff] }
 0x73d   :  { %v2368_v46 = vmul.f32 -1.442695, %v1659_v29  ;;  %v2370_v30 = vmul.f32 -1.442695, %v3258_v15  ;;  %v2034_v15 = vld [vmem:[#allocation7 + $0x38] sm:$0xff] }
 0x73e   :  { %v2369_v22 = vmul.f32 -1.442695, %v1660_v19  ;;  %v2032_v19 = vld [vmem:[#allocation7 + $0x28] sm:$0xff] }
 0x73f   :  { %3385 = vpow2.f32 %v2368_v46  ;;  %v3157_v46 = vpack.c.bf16 %v2032_v19, %v2031_v45 }
 0x740   :  { %3387 = vpow2.f32 %v2369_v22  ;;  %v2033_v22 = vld [vmem:[#allocation7 + $0x30] sm:$0xff] }
 0x741   :  { %3389 = vtanh.f32 %v3259_v44  ;;  %v3160_v44 = vpack.c.bf16 %v2034_v15, %v2033_v22 }
 0x742   :  { %3391 = vpow2.f32 %v2370_v30  ;;  %v2035_v30 = vld [vmem:[#allocation7 + $0x40] sm:$0xff] }
 0x749   :  { %v3386_v37 = vpop.eup %3385 }
 0x74a   :  { %v1672_v47 = vadd.f32 1.0, %v3386_v37  ;;  %v3388_v43 = vpop.eup %3387  ;;  %v2036_v37 = vld [vmem:[#allocation7 + $0x48] sm:$0xff] }
 0x74b   :  { %v1673_v51 = vadd.f32 1.0, %v3388_v43  ;;  %v3390_v41 = vpop.eup %3389  ;;  %v2037_v43 = vld [vmem:[#allocation7 + $0x50] sm:$0xff] }
 0x74c   :  { %3393 = vrcp.f32 %v1672_v47  ;;  %v3392_v17 = vpop.eup %3391  ;;  %v3163_v47 = vpack.c.bf16 %v2036_v37, %v2035_v30  ;;  %v2129_v30 = vld [vmem:[#allocation8 + $0x70] sm:$0xff]  ;;  %v2130_v37 = vld [vmem:[#allocation8 + $0x78] sm:$0xff] }
 0x74d   :  { %3395 = vrcp.f32 %v1673_v51  ;;  %v1674_v55 = vadd.f32 1.0, %v3392_v17  ;;  %v2038_v51 = vld [vmem:[#allocation7 + $0x58] sm:$0xff]  ;;  %v2039_v17 = vld [vmem:[#allocation7 + $0x60] sm:$0xff] }
 0x74f   :  { %3397 = vrcp.f32 %v1674_v55  ;;  %v2042_v55 = vld [vmem:[#allocation7 + $0x78] sm:$0xff] }
 0x756   :  { %v3394_v50 = vpop.eup %3393 }
 0x757   :  { %v1683_v42 = vmul.f32 %v3394_v50, %v3390_v41  ;;  %v3396_v52 = vpop.eup %3395  ;;  %v3166_v41 = vpack.c.bf16 %v2038_v51, %v2037_v43  ;;  %v2040_v50 = vld [vmem:[#allocation7 + $0x68] sm:$0xff]  ;;  %v2352_v43 = vld [vmem:[%s4392_s9] ss:$0 sm:$0xff] }
 0x758   :  { %v1682_v59 = vmul.f32 %v3396_v52, %v4233_v18  ;;  %v2030_v18 = vld [vmem:[#allocation7 + $0x18] sm:$0xff]  ;;  %v2041_v52 = vld [vmem:[#allocation7 + $0x70] sm:$0xff]  ;;  %v2209_v51 = vld [vmem:[#allocation10] sm:$0xff] }
 0x759   :  { %v3398_v7 = vpop.eup %3397 }
 0x75a   :  { %v4277_v5 = vadd.f32 %v1683_v42, %v1682_v59  ;;  %v3169_v42 = vpack.c.bf16 %v2040_v50, %v2039_v17  ;;  %v3172_v59 = vpack.c.bf16 %v2042_v55, %v2041_v52  ;;  %v2211_v55 = vld [vmem:[#allocation10 + $0x10] sm:$0xff] }
 0x75c   :  { %3399 = vtanh.f32 %v4277_v5 }
 0x766   :  { %v3400_v21 = vpop.eup %3399 }
 0x767   :  { %v1686_v29 = vmul.f32 %v3400_v21, %v3398_v7  ;;  %v2116_v7 = vld [vmem:[#allocation8 + $0x8] sm:$0xff]  ;;  %v2117_v21 = vld [vmem:[#allocation8 + $0x10] sm:$0xff] }
 0x769   :  { %1752 = vmatmul.mubr.f32.vlgmr.msra.gmra.mrb[14].mxu0 %v1686_v29  ;;  %1823 = vmatmul.mubr.f32.vlgmr.msra.gmra.mrb[20].mxu1 %v1686_v29 }
 0x76a   :  { %3089 = vmatpush1.bf16.msra.mxu0 %v3844_v32  ;;  %3121 = vmatpush1.bf16.msra.mxu1 %v3975_v61  ;;  %v298_v32 = vadd.f32 %v3977_v62, %v4053_v36 }
 0x76b   :  { %3091 = vmatprep.subr.bf16.mxu0 %v3848_v33  ;;  %3123 = vmatprep.subr.bf16.mxu1 %v3979_v1  ;;  %v300_v33 = vadd.f32 %v3981_v6, %v4051_v31 }
 0x76c   :  { %1921 = vmatprep.mubr.f32.mxu0 %v3584_v0  ;;  %1992 = vmatprep.mubr.f32.mxu1 %v3584_v0 }
 0x76e   :  { %3093 = vmatpush1.bf16.msra.mxu0 %v3858_v39  ;;  %3125 = vmatpush1.bf16.msra.mxu1 %v3984_v9 }
 0x76f   :  { %3095 = vmatprep.subr.bf16.mxu0 %v3862_v40  ;;  %3127 = vmatprep.subr.bf16.mxu1 %v3990_v11 }
 0x772   :  { %3097 = vmatpush1.bf16.msra.mxu0 %v3873_v48  ;;  %3129 = vmatpush1.bf16.msra.mxu1 %v3995_v24 }
 0x773   :  { %3099 = vmatprep.subr.bf16.mxu0 %v3876_v49  ;;  %3131 = vmatprep.subr.bf16.mxu1 %v3998_v25 }
 0x776   :  { %3101 = vmatpush1.bf16.msra.mxu0 %v3882_v57  ;;  %3133 = vmatpush1.bf16.msra.mxu1 %v4001_v34 }
 0x777   :  { %3103 = vmatprep.subr.bf16.mxu0 %v3885_v58  ;;  %3135 = vmatprep.subr.bf16.mxu1 %v4004_v23 }
 0x77a   :  { %3105 = vmatpush1.bf16.msra.mxu0 %v3892_v3  ;;  %3137 = vmatpush1.bf16.msra.mxu1 %v4007_v28 }
 0x77b   :  { %3107 = vmatprep.subr.bf16.mxu0 %v3895_v4  ;;  %3139 = vmatprep.subr.bf16.mxu1 %v4010_v38 }
 0x77e   :  { %3109 = vmatpush1.bf16.msra.mxu0 %v3902_v12  ;;  %3141 = vmatpush1.bf16.msra.mxu1 %v4013_v53 }
 0x77f   :  { %3111 = vmatprep.subr.bf16.mxu0 %v3905_v13  ;;  %3143 = vmatprep.subr.bf16.mxu1 %v4016_v54  ;;  %v2027_v54 = vld [vmem:[#allocation7] sm:$0xff] }
 0x782   :  { %3113 = vmatpush1.bf16.msra.mxu0 %v3912_v26  ;;  %3145 = vmatpush1.bf16.msra.mxu1 %v4019_v63  ;;  %v2028_v63 = vld [vmem:[#allocation7 + $0x8] sm:$0xff] }
 0x783   :  { %3115 = vmatprep.subr.bf16.mxu0 %v3915_v27  ;;  %3147 = vmatprep.subr.bf16.mxu1 %v4022_v2  ;;  %v3151_v2 = vpack.c.bf16 %v2028_v63, %v2027_v54 }
 0x786   :  { %3117 = vmatpush1.bf16.msra.mxu0 %v3922_v35  ;;  %3149 = vmatpush1.bf16.msra.mxu1 %v4025_v8  ;;  %v2029_v8 = vld [vmem:[#allocation7 + $0x10] sm:$0xff] }
 0x787   :  { %3150 = vmatprep.subr.bf16.mxu1 %v3586_v14  ;;  %3174 = vmatprep.subr.bf16.mxu0 %v3586_v14  ;;  %v3154_v16 = vpack.c.bf16 %v2030_v18, %v2029_v8 }
 0x83c   :  { %v1753_v39 = vpop.f32.mrb[14].mxu0  ;;  %v1824_v40 = vpop.f32.mrb[20].mxu1 }
 0x83d   :  { %v1829_v48 = vadd.f32 %v1753_v39, %v298_v32  ;;  %v1755_v49 = vpop.f32.mrb[15].mxu0  ;;  %v1826_v57 = vpop.f32.mrb[21].mxu1  ;;  %v3260_v12 = vadd.f32 %v1824_v40, %v4057_v56  ;;  %v2118_v32 = vld [vmem:[#allocation8 + $0x18] sm:$0xff]  ;;  %v2119_v39 = vld [vmem:[#allocation8 + $0x20] sm:$0xff]  ;;  %v2120_v40 = vld [vmem:[#allocation8 + $0x28] sm:$0xff] }
 0x83e   :  { %v1830_v58 = vadd.f32 %v1755_v49, %v300_v33  ;;  %v3261_v13 = vadd.f32 %v1826_v57, %v4059_v60  ;;  %v3178_v33 = vpack.c.bf16 %v2118_v32, %v2117_v21  ;;  %v2121_v49 = vld [vmem:[#allocation8 + $0x30] sm:$0xff]  ;;  %v2122_v57 = vld [vmem:[#allocation8 + $0x38] sm:$0xff]  ;;  %v2214_v21 = vld [vmem:[#allocation10 + $0x28] sm:$0xff] }
 0x83f   :  { %v2371_v3 = vmul.f32 -1.442695, %v1829_v48  ;;  %v2373_v26 = vmul.f32 -1.442695, %v3260_v12  ;;  %v3181_v48 = vpack.c.bf16 %v2120_v40, %v2119_v39  ;;  %v2215_v32 = vld [vmem:[#allocation10 + $0x30] sm:$0xff]  ;;  %v2217_v40 = vld [vmem:[#allocation10 + $0x40] sm:$0xff] }
 0x840   :  { %v2372_v4 = vmul.f32 -1.442695, %v1830_v58  ;;  %v3184_v58 = vpack.c.bf16 %v2122_v57, %v2121_v49  ;;  %v2220_v57 = vld [vmem:[#allocation10 + $0x58] sm:$0xff] }
 0x841   :  { %3401 = vpow2.f32 %v2371_v3  ;;  %v2123_v3 = vld [vmem:[#allocation8 + $0x40] sm:$0xff] }
 0x842   :  { %3403 = vpow2.f32 %v2372_v4  ;;  %v2124_v4 = vld [vmem:[#allocation8 + $0x48] sm:$0xff] }
 0x843   :  { %3405 = vtanh.f32 %v3261_v13  ;;  %v3187_v12 = vpack.c.bf16 %v2124_v4, %v2123_v3  ;;  %v2125_v13 = vld [vmem:[#allocation8 + $0x50] sm:$0xff]  ;;  %v2221_v3 = vld [vmem:[#allocation10 + $0x60] sm:$0xff]  ;;  %v2222_v4 = vld [vmem:[#allocation10 + $0x68] sm:$0xff] }
 0x844   :  { %3407 = vpow2.f32 %v2373_v26  ;;  %v2126_v26 = vld [vmem:[#allocation8 + $0x58] sm:$0xff] }
 0x84b   :  { %v3402_v27 = vpop.eup %3401 }
 0x84c   :  { %v1842_v35 = vadd.f32 1.0, %v3402_v27  ;;  %v3404_v61 = vpop.eup %3403  ;;  %v3190_v27 = vpack.c.bf16 %v2126_v26, %v2125_v13  ;;  %v2223_v13 = vld [vmem:[#allocation10 + $0x70] sm:$0xff]  ;;  %v2224_v26 = vld [vmem:[#allocation10 + $0x78] sm:$0xff] }
 0x84d   :  { %v1843_v62 = vadd.f32 1.0, %v3404_v61  ;;  %v3406_v1 = vpop.eup %3405  ;;  %v2128_v61 = vld [vmem:[#allocation8 + $0x68] sm:$0xff] }
 0x84e   :  { %3409 = vrcp.f32 %v1842_v35  ;;  %v3408_v6 = vpop.eup %3407  ;;  %v2127_v35 = vld [vmem:[#allocation8 + $0x60] sm:$0xff] }
 0x84f   :  { %3411 = vrcp.f32 %v1843_v62  ;;  %v1844_v25 = vadd.f32 1.0, %v3408_v6  ;;  %v3193_v62 = vpack.c.bf16 %v2128_v61, %v2127_v35  ;;  %v306_v6 = vadd.f32 %v3992_v20, %v4051_v31  ;;  %v2377_v35 = vld [vmem:[%s4394_s11] ss:$0 sm:$0xff]  ;;  %s3545_s11 = scalar_lea.vmem %s2319_s12, 128 }
 0x850   :  { %p3546_p12 = scmp.ne.s32.totalorder %s2319_s12, %s3545_s11  ;;  %p3551_p0 = scmp.lt.s32.totalorder %s3545_s11, %s3545_s11 }
 0x851   :  { %3413 = vrcp.f32 %v1844_v25 }
 0x852   :  { %p3552_p1 = por %p3551_p0, %p3550_p13 }
 0x854   :  { %p3553_p2 = pnand %p3552_p1, %p3546_p12 }
 0x858   :  { %v3410_v9 = vpop.eup %3409 }
 0x859   :  { %v1853_v11 = vmul.f32 %v3410_v9, %v3406_v1  ;;  %v3412_v24 = vpop.eup %3411  ;;  %v304_v1 = vadd.f32 %v3987_v10, %v4053_v36 }
 0x85a   :  { %v1852_v34 = vmul.f32 %v3412_v24, %v4277_v5  ;;  %v2115_v5 = vld [vmem:[#allocation8] sm:$0xff] }
 0x85b   :  { %v3414_v28 = vpop.eup %3413  ;;  %v3175_v29 = vpack.c.bf16 %v2116_v7, %v2115_v5  ;;  %v2213_v7 = vld [vmem:[#allocation10 + $0x20] sm:$0xff] }
 0x85c   :  { %v4321_v23 = vadd.f32 %v1853_v11, %v1852_v34 }
 0x85e   :  { %3415 = vtanh.f32 %v4321_v23 }
 0x868   :  { %v3416_v38 = vpop.eup %3415 }
 0x869   :  { %v1856_v53 = vmul.f32 %v3416_v38, %v3414_v28 }
 0x86b   :  { %1922 = vmatmul.mubr.f32.vlgmr.msra.gmra.mrb[16].mxu0 %v1856_v53  ;;  %1993 = vmatmul.mubr.f32.vlgmr.msra.gmra.mrb[22].mxu1 %v1856_v53 }
 0x86c   :  { %2525 = vmatprep.mubr.msk.f32.mxu1 %vm3587_vm6, %v3584_v0  ;;  %2560 = vmatprep.mubr.msk.f32.mxu0 %vm3587_vm6, %v3584_v0 }
 0x86d   :  { %3152 = vmatpush3.bf16.msra.mxu1 %v3151_v2  ;;  %3176 = vmatpush3.bf16.msra.mxu0 %v3175_v29  ;;  %v3205_v29 = vpack.c.bf16 %v2214_v21, %v2213_v7 }
 0x86e   :  { %3153 = vmatprep.subr.bf16.mxu1 %v3586_v14  ;;  %3177 = vmatprep.subr.bf16.mxu0 %v3586_v14 }
 0x871   :  { %3155 = vmatpush3.bf16.msra.mxu1 %v3154_v16  ;;  %3179 = vmatpush3.bf16.msra.mxu0 %v3178_v33  ;;  %v2216_v33 = vld [vmem:[#allocation10 + $0x38] sm:$0xff] }
 0x872   :  { %3156 = vmatprep.subr.bf16.mxu1 %v3586_v14  ;;  %3180 = vmatprep.subr.bf16.mxu0 %v3586_v14  ;;  %v3208_v39 = vpack.c.bf16 %v2216_v33, %v2215_v32 }
 0x875   :  { %3158 = vmatpush3.bf16.msra.mxu1 %v3157_v46  ;;  %3182 = vmatpush3.bf16.msra.mxu0 %v3181_v48  ;;  %v2218_v48 = vld [vmem:[#allocation10 + $0x48] sm:$0xff] }
 0x876   :  { %3159 = vmatprep.subr.bf16.mxu1 %v3586_v14  ;;  %3183 = vmatprep.subr.bf16.mxu0 %v3586_v14  ;;  %v3211_v49 = vpack.c.bf16 %v2218_v48, %v2217_v40 }
 0x879   :  { %3161 = vmatpush3.bf16.msra.mxu1 %v3160_v44  ;;  %3185 = vmatpush3.bf16.msra.mxu0 %v3184_v58 }
 0x87a   :  { %3162 = vmatprep.subr.bf16.mxu1 %v3586_v14  ;;  %3186 = vmatprep.subr.bf16.mxu0 %v3586_v14 }
 0x87d   :  { %3164 = vmatpush3.bf16.msra.mxu1 %v3163_v47  ;;  %3188 = vmatpush3.bf16.msra.mxu0 %v3187_v12  ;;  %v3196_v47 = vpack.c.bf16 %v2130_v37, %v2129_v30  ;;  %v3217_v12 = vpack.c.bf16 %v2222_v4, %v2221_v3 }
 0x87e   :  { %3165 = vmatprep.subr.bf16.mxu1 %v3586_v14  ;;  %3189 = vmatprep.subr.bf16.mxu0 %v3586_v14 }
 0x881   :  { %3167 = vmatpush3.bf16.msra.mxu1 %v3166_v41  ;;  %3191 = vmatpush3.bf16.msra.mxu0 %v3190_v27  ;;  %v2210_v41 = vld [vmem:[#allocation10 + $0x8] sm:$0xff]  ;;  %v3220_v27 = vpack.c.bf16 %v2224_v26, %v2223_v13 }
 0x882   :  { %3168 = vmatprep.subr.bf16.mxu1 %v3586_v14  ;;  %3192 = vmatprep.subr.bf16.mxu0 %v3586_v14 }
 0x885   :  { %3170 = vmatpush3.bf16.msra.mxu1 %v3169_v42  ;;  %3194 = vmatpush3.bf16.msra.mxu0 %v3193_v62  ;;  %v3199_v42 = vpack.c.bf16 %v2210_v41, %v2209_v51 }
 0x886   :  { %3171 = vmatprep.subr.bf16.mxu1 %v3586_v14  ;;  %3195 = vmatprep.subr.bf16.mxu0 %v3586_v14 }
 0x889   :  { %3173 = vmatpush3.bf16.msra.mxu1 %v3172_v59  ;;  %3197 = vmatpush3.bf16.msra.mxu0 %v3196_v47  ;;  %v2212_v59 = vld [vmem:[#allocation10 + $0x18] sm:$0xff] }
 0x88a   :  { %3198 = vmatprep.subr.bf16.mxu0 %v3586_v14  ;;  %v3202_v5 = vpack.c.bf16 %v2212_v59, %v2211_v55 }
 0x93e   :  { %v1923_v9 = vpop.f32.mrb[16].mxu0  ;;  %v1994_v11 = vpop.f32.mrb[22].mxu1 }
 0x93f   :  { %v1999_v24 = vadd.f32 %v1923_v9, %v304_v1  ;;  %v1925_v25 = vpop.f32.mrb[17].mxu0  ;;  %v1996_v34 = vpop.f32.mrb[23].mxu1  ;;  %v3262_v54 = vadd.f32 %v1994_v11, %v4057_v56  ;;  %v2378_v9 = vld [vmem:[%s4396_s13] ss:$0 sm:$0xff] }
 0x940   :  { %v2000_v28 = vadd.f32 %v1925_v25, %v306_v6  ;;  %v3263_v63 = vadd.f32 %v1996_v34, %v4059_v60  ;;  %v2379_v25 = vld [vmem:[%s4397_s14] ss:$0 sm:$0xff] }
 0x941   :  { %v2374_v38 = vmul.f32 -1.442695, %v1999_v24  ;;  %v2376_v2 = vmul.f32 -1.442695, %v3262_v54 }
 0x942   :  { %v2375_v53 = vmul.f32 -1.442695, %v2000_v28 }
 0x943   :  { %3417 = vpow2.f32 %v2374_v38 }
 0x944   :  { %3419 = vpow2.f32 %v2375_v53 }
 0x945   :  { %3421 = vtanh.f32 %v3263_v63 }
 0x946   :  { %3423 = vpow2.f32 %v2376_v2 }
 0x94d   :  { %v3418_v8 = vpop.eup %3417 }
 0x94e   :  { %v2012_v10 = vadd.f32 1.0, %v3418_v8  ;;  %v3420_v36 = vpop.eup %3419 }
 0x94f   :  { %v2013_v20 = vadd.f32 1.0, %v3420_v36  ;;  %v3422_v31 = vpop.eup %3421 }
 0x950   :  { %3425 = vrcp.f32 %v2012_v10  ;;  %v3424_v18 = vpop.eup %3423 }
 0x951   :  { %3427 = vrcp.f32 %v2013_v20  ;;  %v2014_v46 = vadd.f32 1.0, %v3424_v18 }
 0x953   :  { %3429 = vrcp.f32 %v2014_v46 }
 0x95a   :  { %v3426_v16 = vpop.eup %3425 }
 0x95b   :  { %v2023_v45 = vmul.f32 %v3426_v16, %v3422_v31  ;;  %v3428_v19 = vpop.eup %3427 }
 0x95c   :  { %v2022_v22 = vmul.f32 %v3428_v19, %v4321_v23 }
 0x95d   :  { %v3430_v60 = vpop.eup %3429 }
 0x95e   :  { %v2024_v56 = vadd.f32 %v2023_v45, %v2022_v22 }
 0x960   :  { %3431 = vtanh.f32 %v2024_v56 }
 0x96a   :  { %v3432_v15 = vpop.eup %3431 }
 0x96b   :  { %v2026_v44 = vmul.f32 %v3432_v15, %v3430_v60 }
 0x96d   :  { %2526 = vmatmul.mubr.f32.vlgmr.msra.gmra.mrb[24].mxu1 %v2026_v44 }
 0xa40   :  { %v2109_v23 = vpop.f32.mrb[24].mxu1 }
 0xa41   :  { %v3264_v17 = vadd.f32 %v2352_v43, %v2109_v23  ;;  %v2527_v50 = vpop.f32.mrb[25].mxu1 }
 0xa43   :  { %v2114_v52 = vmax.f32 %v3264_v17, 0.0 }
 0xa45   :  { %2561 = vmatmul.mubr.f32.vlgmr.msra.gmra.mrb[18].mxu0 %v2114_v52 }
 0xa46   :  { %3200 = vmatpush3.bf16.msra.mxu0 %v3199_v42  ;;  %2595 = vmatprep.mubr.msk.f32.mxu0 %vm3587_vm6, %v3584_v0  ;;  %v2219_v0 = vld [vmem:[#allocation10 + $0x50] sm:$0xff] }
 0xa47   :  { %3201 = vmatprep.subr.bf16.mxu0 %v3586_v14  ;;  %v3214_v58 = vpack.c.bf16 %v2220_v57, %v2219_v0 }
 0xa4a   :  { %3203 = vmatpush3.bf16.msra.mxu0 %v3202_v5 }
 0xa4b   :  { %3204 = vmatprep.subr.bf16.mxu0 %v3586_v14 }
 0xa4e   :  { %3206 = vmatpush3.bf16.msra.mxu0 %v3205_v29 }
 0xa4f   :  { %3207 = vmatprep.subr.bf16.mxu0 %v3586_v14 }
 0xa52   :  { %3209 = vmatpush3.bf16.msra.mxu0 %v3208_v39 }
 0xa53   :  { %3210 = vmatprep.subr.bf16.mxu0 %v3586_v14 }
 0xa56   :  { %3212 = vmatpush3.bf16.msra.mxu0 %v3211_v49 }
 0xa57   :  { %3213 = vmatprep.subr.bf16.mxu0 %v3586_v14 }
 0xa5a   :  { %3215 = vmatpush3.bf16.msra.mxu0 %v3214_v58 }
 0xa5b   :  { %3216 = vmatprep.subr.bf16.mxu0 %v3586_v14 }
 0xa5e   :  { %3218 = vmatpush3.bf16.msra.mxu0 %v3217_v12 }
 0xa5f   :  { %3219 = vmatprep.subr.bf16.mxu0 %v3586_v14 }
 0xa62   :  { %3221 = vmatpush3.bf16.msra.mxu0 %v3220_v27 }
 0xb18   :  { %v2204_v61 = vpop.f32.mrb[18].mxu0 }
 0xb19   :  { %v2205_v62 = vadd.f32 %v2377_v35, %v2204_v61  ;;  %v2562_v1 = vpop.f32.mrb[19].mxu0 }
 0xb1b   :  { %v2208_v6 = vmax.f32 %v2205_v62, 0.0 }
 0xb1d   :  { %2596 = vmatmul.mubr.f32.vlgmr.msra.gmra.mrb[20].mxu0 %v2208_v6 }
 0xbf0   :  { %v2298_v11 = vpop.f32.mrb[20].mxu0 }
 0xbf1   :  { %v2299_v24 = vadd.f32 %v2378_v9, %v2298_v11  ;;  %v2597_v14 = vpop.f32.mrb[21].mxu0 }
 0xbf3   :  { %3433 = vtanh.f32 %v2299_v24 }
 0xbfd   :  { %v3434_v34 = vpop.eup %3433 }
 0xbfe   :  { %v2310_v28 = vmul.f32 %v3434_v34, %v2379_v25 }
 0xc00   :  { %2311 = vst [vmem:[#allocation11] sm:$0xff] %v2310_v28 }
 0xc01   :  { %3556 = shalt.err (!%p3553_p2)
}
 0xc02   :  { %s4403_s29 = sld [smem:[#allocation16_spill]] }
 0xc08   :  { %s3557_s16 = scalar_lea.hbm %s4403_s29, 128 }
 0xc09   :  { %p3558_p3 = scmp.ne.s32.totalorder %s4403_s29, %s3557_s16  ;;  %p3561_p4 = scmp.lt.u32.totalorder %s3557_s16, %s4403_s29 }
 0xc0b   :  { %p3563_p5 = pnand %p3561_p4, %p3558_p3 }
 0xc0d   :  { %3566 = shalt.err (!%p3563_p5)
}
 0xc0e   :  { %2321 = dma.vmem_to_hbm [thread:$0]  %s2319_s12, 128, %s4403_s29, [#allocation4]  }
 0xc0f   :  { %3573 = dma.done.wait [#allocation4], 128  }
 0xc10   :  { %3574 = vsyncadd [#allocation4], 4294967168 }
 0xc11   :  { %2325 = vsyncpa [#allocation3], 1 }
 0xc12   :  { %2326 = vsyncpa [#allocation6], 1 }
 0xc13   :  { %2327 = vsyncpa [#allocation9], 1 }
 0xc14   :  { %2328 = vsyncpa [#allocation4], 1 }

</bundles_post_ra>
